<compile_context>
chip_gen: v5e
topology: v5e:2x2
jax: 0.10.0
libtpu: 0.0.40
codegen_flags: <defaults>
</compile_context>

<pallas_src>
import jax
import jax.numpy as jnp
from jax.experimental import pallas as pl
from jax.experimental.pallas import tpu as pltpu

# ---- small synthetic config (mirrors CLIPTextModel config_dict) -------------
B = 2            # batch
S = 8            # sequence length (power of two here -> bitwise batch-block mask)
D = 64           # hidden_size
H = 4            # num_attention_heads
DH = D // H      # head dim
I = 128          # intermediate_size
L = 2            # num_hidden_layers
VOCAB = 1000     # vocab_size (shrunk from 49408)
EPS = 1e-5       # torch.nn.LayerNorm default eps
NEG_INF = -1e30  # finite stand-in for -inf (NaN-safe)
BS = B * S

assert S & (S - 1) == 0, "toy config uses a power-of-two S for the bitwise mask"


def _layernorm(h, g, b):
    mu = jnp.mean(h, axis=-1, keepdims=True)
    var = jnp.mean((h - mu) ** 2, axis=-1, keepdims=True)
    return (h - mu) * jax.lax.rsqrt(var + EPS) * g + b


# ---------------------------- fused Pallas kernel -----------------------------
def clip_encoder_kernel(x_ref,      # (BS, D)      embeddings (constant block)
                        wqkv_ref,   # (1, D, 3D)   fused QKV weight, bf16 (Q pre-scaled)
                        bqkv_ref,   # (1, 1, 3D)   fused QKV bias, f32 (Q pre-scaled)
                        wo_ref,     # (1, D, D)    out_proj weight, bf16
                        w1_ref,     # (1, D, I)    fc1 weight, bf16
                        b1_ref,     # (1, 1, I)    fc1 bias, f32
                        w2_ref,     # (1, I, D)    fc2 weight, bf16
                        vec_ref,    # (1, 6, D)    rows: ln1_g, ln1_b, ln2_g, ln2_b, bo, b2
                        fln_ref,    # (2, D)       final LN gamma, beta
                        o_ref):     # (BS, D)      residual stream / output (resident)
    l = pl.program_id(0)

    # Layer 0: load the embeddings into the VMEM-resident residual stream.
    @pl.when(l == 0)
    def _():
        o_ref[...] = x_ref[...]

    x = o_ref[...]                                      # (BS, D) f32

    # Batch-block-diagonal causal mask over the folded (B*S) token axis,
    # built in-kernel (no HBM input).  S is a power of two -> bitwise block id.
    row = jax.lax.broadcasted_iota(jnp.int32, (BS, BS), 0)
    col = jax.lax.broadcasted_iota(jnp.int32, (BS, BS), 1)
    row_blk = jnp.bitwise_and(row, jnp.int32(-S))
    col_blk = jnp.bitwise_and(col, jnp.int32(-S))
    allowed = (row_blk == col_blk) & (col <= row)
    mask = jnp.where(allowed, jnp.float32(0.0), jnp.float32(NEG_INF))

    vec = vec_ref[0]                                    # (6, D)
    ln1_g, ln1_b = vec[0:1], vec[1:2]
    ln2_g, ln2_b = vec[2:3], vec[3:4]
    bo, b2 = vec[4:5], vec[5:6]

    # ---------------- self attention ----------------
    h = _layernorm(x, ln1_g, ln1_b)                     # (BS, D) f32
    qkv = jnp.dot(h.astype(jnp.bfloat16), wqkv_ref[0],
                  preferred_element_type=jnp.float32) + bqkv_ref[0]   # (BS, 3D)

    o_parts = []
    for hh in range(H):                                 # static unroll over heads
        q_h = qkv[:, hh * DH:(hh + 1) * DH]             # Q already scaled
        k_h = qkv[:, D + hh * DH:D + (hh + 1) * DH]
        v_h = qkv[:, 2 * D + hh * DH:2 * D + (hh + 1) * DH]
        s = jnp.einsum('qd,kd->qk', q_h, k_h,
                       preferred_element_type=jnp.float32) + mask     # (BS, BS)
        s = s - jnp.max(s, axis=-1, keepdims=True)
        p = jnp.exp(s)
        p = p / jnp.sum(p, axis=-1, keepdims=True)      # exact normalization
        o_parts.append(jnp.dot(p, v_h, preferred_element_type=jnp.float32))

    o_cat = jnp.concatenate(o_parts, axis=-1)           # (BS, D), heads in order
    attn = jnp.dot(o_cat.astype(jnp.bfloat16), wo_ref[0],
                   preferred_element_type=jnp.float32) + bo
    x = x + attn

    # ---------------- MLP (quick_gelu) ----------------
    h2 = _layernorm(x, ln2_g, ln2_b)
    m = jnp.dot(h2.astype(jnp.bfloat16), w1_ref[0],
                preferred_element_type=jnp.float32) + b1_ref[0]
    m = m * jax.nn.sigmoid(1.702 * m)                   # quick_gelu (f32)
    x = x + jnp.dot(m.astype(jnp.bfloat16), w2_ref[0],
                    preferred_element_type=jnp.float32) + b2

    # Carry the residual stream; apply the final LayerNorm on the last layer.
    @pl.when(l < L - 1)
    def _():
        o_ref[...] = x

    @pl.when(l == L - 1)
    def _():
        o_ref[...] = _layernorm(x, fln_ref[0:1], fln_ref[1:2])


# ------------------------------ wrappers --------------------------------------
def run_clip_encoder(x, kp):
    xf = x.reshape(BS, D)    # fold batch into the token axis outside the kernel
    out = pl.pallas_call(
        clip_encoder_kernel,
        out_shape=jax.ShapeDtypeStruct((BS, D), jnp.float32),
        grid=(L,),
        in_specs=[
            pl.BlockSpec((BS, D), lambda l: (0, 0)),          # embeddings (fetched once)
            pl.BlockSpec((1, D, 3 * D), lambda l: (l, 0, 0)),  # wqkv   (streamed per layer)
            pl.BlockSpec((1, 1, 3 * D), lambda l: (l, 0, 0)),  # bqkv
            pl.BlockSpec((1, D, D), lambda l: (l, 0, 0)),      # wo
            pl.BlockSpec((1, D, I), lambda l: (l, 0, 0)),      # w1
            pl.BlockSpec((1, 1, I), lambda l: (l, 0, 0)),      # b1
            pl.BlockSpec((1, I, D), lambda l: (l, 0, 0)),      # w2
            pl.BlockSpec((1, 6, D), lambda l: (l, 0, 0)),      # LN/bias vector slab
            pl.BlockSpec((2, D), lambda l: (0, 0)),            # final LN (fetched once)
        ],
        out_specs=pl.BlockSpec((BS, D), lambda l: (0, 0)),     # resident residual stream
        compiler_params=pltpu.CompilerParams(
            dimension_semantics=("arbitrary",),                # layer axis is sequential
            vmem_limit_bytes=48 * 1024 * 1024,
        ),
    )(xf, kp["wqkv"], kp["bqkv"], kp["wo"], kp["w1"], kp["b1"],
      kp["w2"], kp["vecs"], kp["final_ln"])
    return out.reshape(B, S, D)


def sd_clip_forward(tokens, p, kp):
    """SDClipModel.forward with layer='last', return_projected_pooled=True."""
    # CLIPEmbeddings: token embedding + position embedding (plain-JAX gather)
    x = p["tok_emb"][tokens] + p["pos_emb"][None, :, :]       # (B, S, D) f32
    # CLIPEncoder (all layers) + final_layer_norm in one fused kernel
    z = run_clip_encoder(x, kp)
    # pooled = z[arange(B), argmax(tokens)]  (matches CLIP only if EOS has max id)
    pooled = z[jnp.arange(B), jnp.argmax(tokens, axis=-1)]    # (B, D)
    # text_projection (initialized to identity, as in CLIPTextModel.__init__)
    pooled_proj = pooled @ p["text_proj"].T
    return z.astype(jnp.float32), pooled_proj.astype(jnp.float32)


# --------------------------- parameter init -----------------------------------
def init_params(key):
    keys = jax.random.split(key, 2 + L)
    p = {}
    p["tok_emb"] = (jax.random.normal(keys[0], (VOCAB, D)) * 0.02).astype(jnp.float32)
    p["pos_emb"] = (jax.random.normal(keys[1], (S, D)) * 0.02).astype(jnp.float32)
    p["final_ln_g"] = jnp.ones((1, D), jnp.float32)
    p["final_ln_b"] = jnp.zeros((1, D), jnp.float32)
    p["text_proj"] = jnp.eye(D, dtype=jnp.float32)  # module copies eye into it

    def lin(kk, din, dout):
        # Weights made exactly bf16-representable so the kernel's bf16 weight
        # slabs are a lossless cast of the f32 reference weights.
        w = (jax.random.normal(kk, (din, dout)) * 0.02)
        return w.astype(jnp.bfloat16).astype(jnp.float32)

    def vec(kk, d):
        return (jax.random.normal(kk, (1, d)) * 0.01).astype(jnp.float32)

    layers = []
    for li in range(L):
        k = jax.random.split(keys[2 + li], 12)
        layer = [
            jnp.ones((1, D), jnp.float32), jnp.zeros((1, D), jnp.float32),  # ln1
            lin(k[0], D, D), vec(k[1], D),                                  # q
            lin(k[2], D, D), vec(k[3], D),                                  # k
            lin(k[4], D, D), vec(k[5], D),                                  # v
            lin(k[6], D, D), vec(k[7], D),                                  # out_proj
            jnp.ones((1, D), jnp.float32), jnp.zeros((1, D), jnp.float32),  # ln2
            lin(k[8], D, I), vec(k[9], I),                                  # fc1
            lin(k[10], I, D), vec(k[11], D),                                # fc2
        ]
        layers.append(layer)
    p["layers"] = layers
    return p


def pack_params(p):
    """Repack torch-layout params into the kernel's fused, layer-streamed slabs."""
    scale = 1.0 / float(DH) ** 0.5   # exact power of two; folded into Q weight/bias

    wqkv_l, bqkv_l, wo_l, w1_l, b1_l, w2_l, vec_l = ([] for _ in range(7))
    for (l1g, l1b, wq, bq, wk, bk, wv, bv, wo, bo,
         l2g, l2b, w1, b1, w2, b2) in p["layers"]:
        wqkv_l.append(jnp.concatenate([wq * scale, wk, wv], axis=1))   # (D, 3D)
        bqkv_l.append(jnp.concatenate([bq * scale, bk, bv], axis=1))   # (1, 3D)
        wo_l.append(wo)                                                # (D, D)
        w1_l.append(w1)
        b1_l.append(b1)
        w2_l.append(w2)
        vec_l.append(jnp.stack(
            [l1g[0], l1b[0], l2g[0], l2b[0], bo[0], b2[0]], axis=0))   # (6, D)

    return {
        "wqkv": jnp.stack(wqkv_l).astype(jnp.bfloat16),   # (L, D, 3D) bf16
        "bqkv": jnp.stack(bqkv_l),                        # (L, 1, 3D) f32
        "wo": jnp.stack(wo_l).astype(jnp.bfloat16),       # (L, D, D)  bf16
        "w1": jnp.stack(w1_l).astype(jnp.bfloat16),       # (L, D, I)  bf16
        "b1": jnp.stack(b1_l),                            # (L, 1, I)  f32
        "w2": jnp.stack(w2_l).astype(jnp.bfloat16),       # (L, I, D)  bf16
        "vecs": jnp.stack(vec_l),                         # (L, 6, D)  f32
        "final_ln": jnp.concatenate(
            [p["final_ln_g"], p["final_ln_b"]], axis=0),  # (2, D)     f32
    }


# ------------------------- pure-JAX reference ---------------------------------
def reference_forward(tokens, p):
    def ln(h, g, b):
        mu = h.mean(-1, keepdims=True)
        var = ((h - mu) ** 2).mean(-1, keepdims=True)
        return (h - mu) / jnp.sqrt(var + EPS) * g + b

    x = p["tok_emb"][tokens] + p["pos_emb"][None]
    row = jnp.arange(S)
    mask = jnp.where(row[None, :] > row[:, None], -jnp.inf, 0.0)
    for (l1g, l1b, wq, bq, wk, bk, wv, bv, wo, bo,
         l2g, l2b, w1, b1, w2, b2) in p["layers"]:
        h = ln(x, l1g, l1b)
        q, k, v = h @ wq + bq, h @ wk + bk, h @ wv + bv
        qh = q.reshape(B, S, H, DH).transpose(0, 2, 1, 3)
        kh = k.reshape(B, S, H, DH).transpose(0, 2, 1, 3)
        vh = v.reshape(B, S, H, DH).transpose(0, 2, 1, 3)
        s = jnp.einsum("bhqd,bhkd->bhqk", qh, kh) / jnp.sqrt(float(DH)) + mask
        pr = jax.nn.softmax(s, axis=-1)
        o = jnp.einsum("bhqk,bhkd->bhqd", pr, vh).transpose(0, 2, 1, 3).reshape(B, S, D)
        x = x + (o @ wo + bo)
        h2 = ln(x, l2g, l2b)
        m = h2 @ w1 + b1
        m = m * jax.nn.sigmoid(1.702 * m)
        x = x + (m @ w2 + b2)
    z = ln(x, p["final_ln_g"], p["final_ln_b"])
    pooled = z[jnp.arange(B), jnp.argmax(tokens, axis=-1)]
    return z, pooled @ p["text_proj"].T


# ------------------------------------ main -------------------------------------
if __name__ == "__main__":
    key = jax.random.PRNGKey(0)
    kp_key, kt_key = jax.random.split(key)
    params = init_params(kp_key)
    kernel_params = pack_params(params)
    tokens = jax.random.randint(kt_key, (B, S), 0, VOCAB, dtype=jnp.int32)

    z, pooled = sd_clip_forward(tokens, params, kernel_params)
    z = jax.block_until_ready(z)
    pooled = jax.block_until_ready(pooled)

    z_ref, pooled_ref = reference_forward(tokens, params)
    assert z.shape == (B, S, D) and pooled.shape == (B, D)
    # Tolerance accounts for bf16 activation operands at the weight matmuls
    # (weights themselves are bf16-representable, so they match the reference).
    assert jnp.allclose(z, z_ref, atol=3e-2, rtol=3e-2)
    assert jnp.allclose(pooled, pooled_ref, atol=3e-2, rtol=3e-2)

    print("KERNEL_OK")
</pallas_src>

<mosaic_0001>
module attributes {stable_mosaic.version = 11 : i64} {
  func.func @clip_encoder_kernel(%arg0: i32, %arg1: memref<16x64xf32, #tpu.memory_space<vmem>>, %arg2: memref<1x64x192xbf16, #tpu.memory_space<vmem>>, %arg3: memref<1x1x192xf32, #tpu.memory_space<vmem>>, %arg4: memref<1x64x64xbf16, #tpu.memory_space<vmem>>, %arg5: memref<1x64x128xbf16, #tpu.memory_space<vmem>>, %arg6: memref<1x1x128xf32, #tpu.memory_space<vmem>>, %arg7: memref<1x128x64xbf16, #tpu.memory_space<vmem>>, %arg8: memref<1x6x64xf32, #tpu.memory_space<vmem>>, %arg9: memref<2x64xf32, #tpu.memory_space<vmem>>, %arg10: memref<16x64xf32, #tpu.memory_space<vmem>>) attributes {dimension_semantics = [#tpu.dimension_semantics<arbitrary>], iteration_bounds = array<i64: 2>, scalar_prefetch = 0 : i64, scratch_operands = 0 : i64, tpu.core_type = #tpu.core_type<tc>, window_params = [{pipeline_mode = #tpu.pipeline_mode<synchronous>, transform_indices = @transform_0, window_bounds = array<i64: 16, 64>}, {transform_indices = @transform_1, window_bounds = array<i64: 1, 64, 192>}, {transform_indices = @transform_2, window_bounds = array<i64: 1, 1, 192>}, {transform_indices = @transform_3, window_bounds = array<i64: 1, 64, 64>}, {transform_indices = @transform_4, window_bounds = array<i64: 1, 64, 128>}, {transform_indices = @transform_5, window_bounds = array<i64: 1, 1, 128>}, {transform_indices = @transform_6, window_bounds = array<i64: 1, 128, 64>}, {transform_indices = @transform_7, window_bounds = array<i64: 1, 6, 64>}, {pipeline_mode = #tpu.pipeline_mode<synchronous>, transform_indices = @transform_8, window_bounds = array<i64: 2, 64>}, {pipeline_mode = #tpu.pipeline_mode<synchronous>, transform_indices = @transform_9, window_bounds = array<i64: 16, 64>}]} {
    %c0_i32 = arith.constant 0 : i32
    %0 = arith.cmpi eq, %arg0, %c0_i32 : i32
    %1 = arith.extui %0 : i1 to i32
    %c0_i32_0 = arith.constant 0 : i32
    %2 = arith.cmpi ne, %1, %c0_i32_0 : i32
    scf.if %2 {
      %c0_60 = arith.constant 0 : index
      %c0_61 = arith.constant 0 : index
      %173 = vector.load %arg1[%c0_60, %c0_61] : memref<16x64xf32, #tpu.memory_space<vmem>>, vector<16x64xf32>
      %c0_62 = arith.constant 0 : index
      %c0_63 = arith.constant 0 : index
      %174 = vector.load %arg10[%c0_62, %c0_63] : memref<16x64xf32, #tpu.memory_space<vmem>>, vector<16x64xf32>
      tpu.vector_store %arg10[%c0_62, %c0_63], %173 {strides = array<i32>} : memref<16x64xf32, #tpu.memory_space<vmem>>, vector<16x64xf32>,
    } else {
    }
    %c0 = arith.constant 0 : index
    %c0_1 = arith.constant 0 : index
    %3 = vector.load %arg10[%c0, %c0_1] : memref<16x64xf32, #tpu.memory_space<vmem>>, vector<16x64xf32>
    %4 = tpu.iota {dimensions = array<i32: 0>} : vector<16x16xi32>
    %5 = tpu.iota {dimensions = array<i32: 1>} : vector<16x16xi32>
    %c-8_i32 = arith.constant -8 : i32
    %6 = vector.broadcast %c-8_i32 : i32 to vector<16x16xi32>
    %7 = arith.andi %4, %6 : vector<16x16xi32>
    %c-8_i32_2 = arith.constant -8 : i32
    %8 = vector.broadcast %c-8_i32_2 : i32 to vector<16x16xi32>
    %9 = arith.andi %5, %8 : vector<16x16xi32>
    %10 = arith.cmpi eq, %7, %9 : vector<16x16xi32>
    %11 = arith.cmpi sle, %5, %4 : vector<16x16xi32>
    %12 = arith.andi %10, %11 : vector<16x16xi1>
    %cst = arith.constant 0.000000e+00 : f32
    %cst_3 = arith.constant -1.000000e+30 : f32
    %13 = vector.broadcast %cst : f32 to vector<16x16xf32>
    %14 = vector.broadcast %cst_3 : f32 to vector<16x16xf32>
    %15 = arith.select %12, %13, %14 : vector<16x16xi1>, vector<16x16xf32>
    %c0_4 = arith.constant 0 : index
    %c0_5 = arith.constant 0 : index
    %c0_6 = arith.constant 0 : index
    %16 = vector.load %arg8[%c0_4, %c0_5, %c0_6] : memref<1x6x64xf32, #tpu.memory_space<vmem>>, vector<1x6x64xf32>
    %17 = vector.shape_cast %16 : vector<1x6x64xf32> to vector<6x64xf32>
    %18 = vector.extract_strided_slice %17 {offsets = [0, 0], sizes = [1, 64], strides = [1, 1]} : vector<6x64xf32> to vector<1x64xf32>
    %19 = vector.extract_strided_slice %17 {offsets = [1, 0], sizes = [1, 64], strides = [1, 1]} : vector<6x64xf32> to vector<1x64xf32>
    %20 = vector.extract_strided_slice %17 {offsets = [2, 0], sizes = [1, 64], strides = [1, 1]} : vector<6x64xf32> to vector<1x64xf32>
    %21 = vector.extract_strided_slice %17 {offsets = [3, 0], sizes = [1, 64], strides = [1, 1]} : vector<6x64xf32> to vector<1x64xf32>
    %22 = vector.extract_strided_slice %17 {offsets = [4, 0], sizes = [1, 64], strides = [1, 1]} : vector<6x64xf32> to vector<1x64xf32>
    %23 = vector.extract_strided_slice %17 {offsets = [5, 0], sizes = [1, 64], strides = [1, 1]} : vector<6x64xf32> to vector<1x64xf32>
    %cst_7 = arith.constant dense<0.000000e+00> : vector<16xf32>
    %24 = vector.multi_reduction <add>, %3, %cst_7 [1] : vector<16x64xf32> to vector<16xf32>
    %25 = vector.shape_cast %24 : vector<16xf32> to vector<16x1xf32>
    %cst_8 = arith.constant 6.400000e+01 : f32
    %26 = vector.broadcast %cst_8 : f32 to vector<16x1xf32>
    %27 = arith.divf %25, %26 : vector<16x1xf32>
    %28 = vector.broadcast %27 : vector<16x1xf32> to vector<16x64xf32>
    %29 = arith.subf %3, %28 : vector<16x64xf32>
    %30 = arith.mulf %29, %29 : vector<16x64xf32>
    %cst_9 = arith.constant dense<0.000000e+00> : vector<16xf32>
    %31 = vector.multi_reduction <add>, %30, %cst_9 [1] : vector<16x64xf32> to vector<16xf32>
    %32 = vector.shape_cast %31 : vector<16xf32> to vector<16x1xf32>
    %cst_10 = arith.constant 6.400000e+01 : f32
    %33 = vector.broadcast %cst_10 : f32 to vector<16x1xf32>
    %34 = arith.divf %32, %33 : vector<16x1xf32>
    %35 = vector.broadcast %27 : vector<16x1xf32> to vector<16x64xf32>
    %36 = arith.subf %3, %35 : vector<16x64xf32>
    %cst_11 = arith.constant 9.99999974E-6 : f32
    %37 = vector.broadcast %cst_11 : f32 to vector<16x1xf32>
    %38 = arith.addf %34, %37 : vector<16x1xf32>
    %39 = math.rsqrt %38 : vector<16x1xf32>
    %40 = vector.broadcast %39 : vector<16x1xf32> to vector<16x64xf32>
    %41 = arith.mulf %36, %40 : vector<16x64xf32>
    %42 = vector.broadcast %18 : vector<1x64xf32> to vector<16x64xf32>
    %43 = arith.mulf %41, %42 : vector<16x64xf32>
    %44 = vector.broadcast %19 : vector<1x64xf32> to vector<16x64xf32>
    %45 = arith.addf %43, %44 : vector<16x64xf32>
    %46 = arith.truncf %45 : vector<16x64xf32> to vector<16x64xbf16>
    %c0_12 = arith.constant 0 : index
    %c0_13 = arith.constant 0 : index
    %c0_14 = arith.constant 0 : index
    %47 = vector.load %arg2[%c0_12, %c0_13, %c0_14] : memref<1x64x192xbf16, #tpu.memory_space<vmem>>, vector<1x64x192xbf16>
    %48 = vector.shape_cast %47 : vector<1x64x192xbf16> to vector<64x192xbf16>
    %cst_15 = arith.constant dense<0.000000e+00> : vector<16x192xf32>
    %49 = tpu.matmul %46, %48, %cst_15 {dimension_numbers = #tpu.dot_dimension_numbers<[1], [0], [0], [1], [0, 0, 1, 1], [], []>} : vector<16x64xbf16>, vector<64x192xbf16>, vector<16x192xf32> -> vector<16x192xf32>
    %c0_16 = arith.constant 0 : index
    %c0_17 = arith.constant 0 : index
    %c0_18 = arith.constant 0 : index
    %50 = vector.load %arg3[%c0_16, %c0_17, %c0_18] : memref<1x1x192xf32, #tpu.memory_space<vmem>>, vector<1x1x192xf32>
    %51 = vector.shape_cast %50 : vector<1x1x192xf32> to vector<1x192xf32>
    %52 = vector.broadcast %51 : vector<1x192xf32> to vector<16x192xf32>
    %53 = arith.addf %49, %52 : vector<16x192xf32>
    %54 = vector.extract_strided_slice %53 {offsets = [0, 0], sizes = [16, 16], strides = [1, 1]} : vector<16x192xf32> to vector<16x16xf32>
    %55 = vector.extract_strided_slice %53 {offsets = [0, 64], sizes = [16, 16], strides = [1, 1]} : vector<16x192xf32> to vector<16x16xf32>
    %56 = vector.extract_strided_slice %53 {offsets = [0, 128], sizes = [16, 16], strides = [1, 1]} : vector<16x192xf32> to vector<16x16xf32>
    "tpu.trace_start"() <{level = 10 : i32, message = "qd,kd->qk"}> : () -> ()
    %cst_19 = arith.constant dense<0.000000e+00> : vector<16x16xf32>
    %57 = tpu.matmul %54, %55, %cst_19 {dimension_numbers = #tpu.dot_dimension_numbers<[1], [1], [0], [0], [0, 0, 1, 0], [], []>} : vector<16x16xf32>, vector<16x16xf32>, vector<16x16xf32> -> vector<16x16xf32>
    "tpu.trace_stop"() : () -> ()
    %58 = arith.addf %57, %15 : vector<16x16xf32>
    %cst_20 = arith.constant dense<0xFF800000> : vector<16xf32>
    %59 = vector.multi_reduction <maximumf>, %58, %cst_20 [1] : vector<16x16xf32> to vector<16xf32>
    %60 = vector.shape_cast %59 : vector<16xf32> to vector<16x1xf32>
    %61 = vector.broadcast %60 : vector<16x1xf32> to vector<16x16xf32>
    %62 = arith.subf %58, %61 : vector<16x16xf32>
    %63 = math.exp %62 : vector<16x16xf32>
    %cst_21 = arith.constant dense<0.000000e+00> : vector<16xf32>
    %64 = vector.multi_reduction <add>, %63, %cst_21 [1] : vector<16x16xf32> to vector<16xf32>
    %65 = vector.shape_cast %64 : vector<16xf32> to vector<16x1xf32>
    %66 = vector.broadcast %65 : vector<16x1xf32> to vector<16x16xf32>
    %67 = arith.divf %63, %66 : vector<16x16xf32>
    %cst_22 = arith.constant dense<0.000000e+00> : vector<16x16xf32>
    %68 = tpu.matmul %67, %56, %cst_22 {dimension_numbers = #tpu.dot_dimension_numbers<[1], [0], [0], [1], [0, 0, 1, 1], [], []>} : vector<16x16xf32>, vector<16x16xf32>, vector<16x16xf32> -> vector<16x16xf32>
    %69 = vector.extract_strided_slice %53 {offsets = [0, 16], sizes = [16, 16], strides = [1, 1]} : vector<16x192xf32> to vector<16x16xf32>
    %70 = vector.extract_strided_slice %53 {offsets = [0, 80], sizes = [16, 16], strides = [1, 1]} : vector<16x192xf32> to vector<16x16xf32>
    %71 = vector.extract_strided_slice %53 {offsets = [0, 144], sizes = [16, 16], strides = [1, 1]} : vector<16x192xf32> to vector<16x16xf32>
    "tpu.trace_start"() <{level = 10 : i32, message = "qd,kd->qk"}> : () -> ()
    %cst_23 = arith.constant dense<0.000000e+00> : vector<16x16xf32>
    %72 = tpu.matmul %69, %70, %cst_23 {dimension_numbers = #tpu.dot_dimension_numbers<[1], [1], [0], [0], [0, 0, 1, 0], [], []>} : vector<16x16xf32>, vector<16x16xf32>, vector<16x16xf32> -> vector<16x16xf32>
    "tpu.trace_stop"() : () -> ()
    %73 = arith.addf %72, %15 : vector<16x16xf32>
    %cst_24 = arith.constant dense<0xFF800000> : vector<16xf32>
    %74 = vector.multi_reduction <maximumf>, %73, %cst_24 [1] : vector<16x16xf32> to vector<16xf32>
    %75 = vector.shape_cast %74 : vector<16xf32> to vector<16x1xf32>
    %76 = vector.broadcast %75 : vector<16x1xf32> to vector<16x16xf32>
    %77 = arith.subf %73, %76 : vector<16x16xf32>
    %78 = math.exp %77 : vector<16x16xf32>
    %cst_25 = arith.constant dense<0.000000e+00> : vector<16xf32>
    %79 = vector.multi_reduction <add>, %78, %cst_25 [1] : vector<16x16xf32> to vector<16xf32>
    %80 = vector.shape_cast %79 : vector<16xf32> to vector<16x1xf32>
    %81 = vector.broadcast %80 : vector<16x1xf32> to vector<16x16xf32>
    %82 = arith.divf %78, %81 : vector<16x16xf32>
    %cst_26 = arith.constant dense<0.000000e+00> : vector<16x16xf32>
    %83 = tpu.matmul %82, %71, %cst_26 {dimension_numbers = #tpu.dot_dimension_numbers<[1], [0], [0], [1], [0, 0, 1, 1], [], []>} : vector<16x16xf32>, vector<16x16xf32>, vector<16x16xf32> -> vector<16x16xf32>
    %84 = vector.extract_strided_slice %53 {offsets = [0, 32], sizes = [16, 16], strides = [1, 1]} : vector<16x192xf32> to vector<16x16xf32>
    %85 = vector.extract_strided_slice %53 {offsets = [0, 96], sizes = [16, 16], strides = [1, 1]} : vector<16x192xf32> to vector<16x16xf32>
    %86 = vector.extract_strided_slice %53 {offsets = [0, 160], sizes = [16, 16], strides = [1, 1]} : vector<16x192xf32> to vector<16x16xf32>
    "tpu.trace_start"() <{level = 10 : i32, message = "qd,kd->qk"}> : () -> ()
    %cst_27 = arith.constant dense<0.000000e+00> : vector<16x16xf32>
    %87 = tpu.matmul %84, %85, %cst_27 {dimension_numbers = #tpu.dot_dimension_numbers<[1], [1], [0], [0], [0, 0, 1, 0], [], []>} : vector<16x16xf32>, vector<16x16xf32>, vector<16x16xf32> -> vector<16x16xf32>
    "tpu.trace_stop"() : () -> ()
    %88 = arith.addf %87, %15 : vector<16x16xf32>
    %cst_28 = arith.constant dense<0xFF800000> : vector<16xf32>
    %89 = vector.multi_reduction <maximumf>, %88, %cst_28 [1] : vector<16x16xf32> to vector<16xf32>
    %90 = vector.shape_cast %89 : vector<16xf32> to vector<16x1xf32>
    %91 = vector.broadcast %90 : vector<16x1xf32> to vector<16x16xf32>
    %92 = arith.subf %88, %91 : vector<16x16xf32>
    %93 = math.exp %92 : vector<16x16xf32>
    %cst_29 = arith.constant dense<0.000000e+00> : vector<16xf32>
    %94 = vector.multi_reduction <add>, %93, %cst_29 [1] : vector<16x16xf32> to vector<16xf32>
    %95 = vector.shape_cast %94 : vector<16xf32> to vector<16x1xf32>
    %96 = vector.broadcast %95 : vector<16x1xf32> to vector<16x16xf32>
    %97 = arith.divf %93, %96 : vector<16x16xf32>
    %cst_30 = arith.constant dense<0.000000e+00> : vector<16x16xf32>
    %98 = tpu.matmul %97, %86, %cst_30 {dimension_numbers = #tpu.dot_dimension_numbers<[1], [0], [0], [1], [0, 0, 1, 1], [], []>} : vector<16x16xf32>, vector<16x16xf32>, vector<16x16xf32> -> vector<16x16xf32>
    %99 = vector.extract_strided_slice %53 {offsets = [0, 48], sizes = [16, 16], strides = [1, 1]} : vector<16x192xf32> to vector<16x16xf32>
    %100 = vector.extract_strided_slice %53 {offsets = [0, 112], sizes = [16, 16], strides = [1, 1]} : vector<16x192xf32> to vector<16x16xf32>
    %101 = vector.extract_strided_slice %53 {offsets = [0, 176], sizes = [16, 16], strides = [1, 1]} : vector<16x192xf32> to vector<16x16xf32>
    "tpu.trace_start"() <{level = 10 : i32, message = "qd,kd->qk"}> : () -> ()
    %cst_31 = arith.constant dense<0.000000e+00> : vector<16x16xf32>
    %102 = tpu.matmul %99, %100, %cst_31 {dimension_numbers = #tpu.dot_dimension_numbers<[1], [1], [0], [0], [0, 0, 1, 0], [], []>} : vector<16x16xf32>, vector<16x16xf32>, vector<16x16xf32> -> vector<16x16xf32>
    "tpu.trace_stop"() : () -> ()
    %103 = arith.addf %102, %15 : vector<16x16xf32>
    %cst_32 = arith.constant dense<0xFF800000> : vector<16xf32>
    %104 = vector.multi_reduction <maximumf>, %103, %cst_32 [1] : vector<16x16xf32> to vector<16xf32>
    %105 = vector.shape_cast %104 : vector<16xf32> to vector<16x1xf32>
    %106 = vector.broadcast %105 : vector<16x1xf32> to vector<16x16xf32>
    %107 = arith.subf %103, %106 : vector<16x16xf32>
    %108 = math.exp %107 : vector<16x16xf32>
    %cst_33 = arith.constant dense<0.000000e+00> : vector<16xf32>
    %109 = vector.multi_reduction <add>, %108, %cst_33 [1] : vector<16x16xf32> to vector<16xf32>
    %110 = vector.shape_cast %109 : vector<16xf32> to vector<16x1xf32>
    %111 = vector.broadcast %110 : vector<16x1xf32> to vector<16x16xf32>
    %112 = arith.divf %108, %111 : vector<16x16xf32>
    %cst_34 = arith.constant dense<0.000000e+00> : vector<16x16xf32>
    %113 = tpu.matmul %112, %101, %cst_34 {dimension_numbers = #tpu.dot_dimension_numbers<[1], [0], [0], [1], [0, 0, 1, 1], [], []>} : vector<16x16xf32>, vector<16x16xf32>, vector<16x16xf32> -> vector<16x16xf32>
    %114 = tpu.concatenate %68, %83, %98, %113 in 1 : vector<16x16xf32>, vector<16x16xf32>, vector<16x16xf32>, vector<16x16xf32> -> vector<16x64xf32>
    %115 = arith.truncf %114 : vector<16x64xf32> to vector<16x64xbf16>
    %c0_35 = arith.constant 0 : index
    %c0_36 = arith.constant 0 : index
    %c0_37 = arith.constant 0 : index
    %116 = vector.load %arg4[%c0_35, %c0_36, %c0_37] : memref<1x64x64xbf16, #tpu.memory_space<vmem>>, vector<1x64x64xbf16>
    %117 = vector.shape_cast %116 : vector<1x64x64xbf16> to vector<64x64xbf16>
    %cst_38 = arith.constant dense<0.000000e+00> : vector<16x64xf32>
    %118 = tpu.matmul %115, %117, %cst_38 {dimension_numbers = #tpu.dot_dimension_numbers<[1], [0], [0], [1], [0, 0, 1, 1], [], []>} : vector<16x64xbf16>, vector<64x64xbf16>, vector<16x64xf32> -> vector<16x64xf32>
    %119 = vector.broadcast %22 : vector<1x64xf32> to vector<16x64xf32>
    %120 = arith.addf %118, %119 : vector<16x64xf32>
    %121 = arith.addf %3, %120 : vector<16x64xf32>
    %cst_39 = arith.constant dense<0.000000e+00> : vector<16xf32>
    %122 = vector.multi_reduction <add>, %121, %cst_39 [1] : vector<16x64xf32> to vector<16xf32>
    %123 = vector.shape_cast %122 : vector<16xf32> to vector<16x1xf32>
    %cst_40 = arith.constant 6.400000e+01 : f32
    %124 = vector.broadcast %cst_40 : f32 to vector<16x1xf32>
    %125 = arith.divf %123, %124 : vector<16x1xf32>
    %126 = vector.broadcast %125 : vector<16x1xf32> to vector<16x64xf32>
    %127 = arith.subf %121, %126 : vector<16x64xf32>
    %128 = arith.mulf %127, %127 : vector<16x64xf32>
    %cst_41 = arith.constant dense<0.000000e+00> : vector<16xf32>
    %129 = vector.multi_reduction <add>, %128, %cst_41 [1] : vector<16x64xf32> to vector<16xf32>
    %130 = vector.shape_cast %129 : vector<16xf32> to vector<16x1xf32>
    %cst_42 = arith.constant 6.400000e+01 : f32
    %131 = vector.broadcast %cst_42 : f32 to vector<16x1xf32>
    %132 = arith.divf %130, %131 : vector<16x1xf32>
    %133 = vector.broadcast %125 : vector<16x1xf32> to vector<16x64xf32>
    %134 = arith.subf %121, %133 : vector<16x64xf32>
    %cst_43 = arith.constant 9.99999974E-6 : f32
    %135 = vector.broadcast %cst_43 : f32 to vector<16x1xf32>
    %136 = arith.addf %132, %135 : vector<16x1xf32>
    %137 = math.rsqrt %136 : vector<16x1xf32>
    %138 = vector.broadcast %137 : vector<16x1xf32> to vector<16x64xf32>
    %139 = arith.mulf %134, %138 : vector<16x64xf32>
    %140 = vector.broadcast %20 : vector<1x64xf32> to vector<16x64xf32>
    %141 = arith.mulf %139, %140 : vector<16x64xf32>
    %142 = vector.broadcast %21 : vector<1x64xf32> to vector<16x64xf32>
    %143 = arith.addf %141, %142 : vector<16x64xf32>
    %144 = arith.truncf %143 : vector<16x64xf32> to vector<16x64xbf16>
    %c0_44 = arith.constant 0 : index
    %c0_45 = arith.constant 0 : index
    %c0_46 = arith.constant 0 : index
    %145 = vector.load %arg5[%c0_44, %c0_45, %c0_46] : memref<1x64x128xbf16, #tpu.memory_space<vmem>>, vector<1x64x128xbf16>
    %146 = vector.shape_cast %145 : vector<1x64x128xbf16> to vector<64x128xbf16>
    %cst_47 = arith.constant dense<0.000000e+00> : vector<16x128xf32>
    %147 = tpu.matmul %144, %146, %cst_47 {dimension_numbers = #tpu.dot_dimension_numbers<[1], [0], [0], [1], [0, 0, 1, 1], [], []>} : vector<16x64xbf16>, vector<64x128xbf16>, vector<16x128xf32> -> vector<16x128xf32>
    %c0_48 = arith.constant 0 : index
    %c0_49 = arith.constant 0 : index
    %c0_50 = arith.constant 0 : index
    %148 = vector.load %arg6[%c0_48, %c0_49, %c0_50] : memref<1x1x128xf32, #tpu.memory_space<vmem>>, vector<1x1x128xf32>
    %149 = vector.shape_cast %148 : vector<1x1x128xf32> to vector<1x128xf32>
    %150 = vector.broadcast %149 : vector<1x128xf32> to vector<16x128xf32>
    %151 = arith.addf %147, %150 : vector<16x128xf32>
    %cst_51 = arith.constant 1.702000e+00 : f32
    %152 = vector.broadcast %cst_51 : f32 to vector<16x128xf32>
    %153 = arith.mulf %152, %151 : vector<16x128xf32>
    %154 = arith.negf %153 : vector<16x128xf32>
    %155 = math.exp %154 : vector<16x128xf32>
    %cst_52 = arith.constant 1.000000e+00 : f32
    %156 = vector.broadcast %cst_52 : f32 to vector<16x128xf32>
    %157 = arith.addf %156, %155 : vector<16x128xf32>
    %158 = arith.divf %156, %157 : vector<16x128xf32>
    %159 = arith.mulf %151, %158 : vector<16x128xf32>
    %160 = arith.truncf %159 : vector<16x128xf32> to vector<16x128xbf16>
    %c0_53 = arith.constant 0 : index
    %c0_54 = arith.constant 0 : index
    %c0_55 = arith.constant 0 : index
    %161 = vector.load %arg7[%c0_53, %c0_54, %c0_55] : memref<1x128x64xbf16, #tpu.memory_space<vmem>>, vector<1x128x64xbf16>
    %162 = vector.shape_cast %161 : vector<1x128x64xbf16> to vector<128x64xbf16>
    %cst_56 = arith.constant dense<0.000000e+00> : vector<16x64xf32>
    %163 = tpu.matmul %160, %162, %cst_56 {dimension_numbers = #tpu.dot_dimension_numbers<[1], [0], [0], [1], [0, 0, 1, 1], [], []>} : vector<16x128xbf16>, vector<128x64xbf16>, vector<16x64xf32> -> vector<16x64xf32>
    %164 = arith.addf %121, %163 : vector<16x64xf32>
    %165 = vector.broadcast %23 : vector<1x64xf32> to vector<16x64xf32>
    %166 = arith.addf %164, %165 : vector<16x64xf32>
    %c1_i32 = arith.constant 1 : i32
    %167 = arith.cmpi slt, %arg0, %c1_i32 : i32
    %168 = arith.extui %167 : i1 to i32
    %c0_i32_57 = arith.constant 0 : i32
    %169 = arith.cmpi ne, %168, %c0_i32_57 : i32
    scf.if %169 {
      %c0_60 = arith.constant 0 : index
      %c0_61 = arith.constant 0 : index
      %173 = vector.load %arg10[%c0_60, %c0_61] : memref<16x64xf32, #tpu.memory_space<vmem>>, vector<16x64xf32>
      tpu.vector_store %arg10[%c0_60, %c0_61], %166 {strides = array<i32>} : memref<16x64xf32, #tpu.memory_space<vmem>>, vector<16x64xf32>,
    } else {
    }
    %c1_i32_58 = arith.constant 1 : i32
    %170 = arith.cmpi eq, %arg0, %c1_i32_58 : i32
    %171 = arith.extui %170 : i1 to i32
    %c0_i32_59 = arith.constant 0 : i32
    %172 = arith.cmpi ne, %171, %c0_i32_59 : i32
    scf.if %172 {
      %c0_60 = arith.constant 0 : index
      %c0_61 = arith.constant 0 : index
      %173 = vector.load %arg9[%c0_60, %c0_61] : memref<2x64xf32, #tpu.memory_space<vmem>>, vector<1x64xf32>
      %c1 = arith.constant 1 : index
      %c0_62 = arith.constant 0 : index
      %174 = vector.load %arg9[%c1, %c0_62] : memref<2x64xf32, #tpu.memory_space<vmem>>, vector<1x64xf32>
      %cst_63 = arith.constant dense<0.000000e+00> : vector<16xf32>
      %175 = vector.multi_reduction <add>, %166, %cst_63 [1] : vector<16x64xf32> to vector<16xf32>
      %176 = vector.shape_cast %175 : vector<16xf32> to vector<16x1xf32>
      %cst_64 = arith.constant 6.400000e+01 : f32
      %177 = vector.broadcast %cst_64 : f32 to vector<16x1xf32>
      %178 = arith.divf %176, %177 : vector<16x1xf32>
      %179 = vector.broadcast %178 : vector<16x1xf32> to vector<16x64xf32>
      %180 = arith.subf %166, %179 : vector<16x64xf32>
      %181 = arith.mulf %180, %180 : vector<16x64xf32>
      %cst_65 = arith.constant dense<0.000000e+00> : vector<16xf32>
      %182 = vector.multi_reduction <add>, %181, %cst_65 [1] : vector<16x64xf32> to vector<16xf32>
      %183 = vector.shape_cast %182 : vector<16xf32> to vector<16x1xf32>
      %cst_66 = arith.constant 6.400000e+01 : f32
      %184 = vector.broadcast %cst_66 : f32 to vector<16x1xf32>
      %185 = arith.divf %183, %184 : vector<16x1xf32>
      %186 = vector.broadcast %178 : vector<16x1xf32> to vector<16x64xf32>
      %187 = arith.subf %166, %186 : vector<16x64xf32>
      %cst_67 = arith.constant 9.99999974E-6 : f32
      %188 = vector.broadcast %cst_67 : f32 to vector<16x1xf32>
      %189 = arith.addf %185, %188 : vector<16x1xf32>
      %190 = math.rsqrt %189 : vector<16x1xf32>
      %191 = vector.broadcast %190 : vector<16x1xf32> to vector<16x64xf32>
      %192 = arith.mulf %187, %191 : vector<16x64xf32>
      %193 = vector.broadcast %173 : vector<1x64xf32> to vector<16x64xf32>
      %194 = arith.mulf %192, %193 : vector<16x64xf32>
      %195 = vector.broadcast %174 : vector<1x64xf32> to vector<16x64xf32>
      %196 = arith.addf %194, %195 : vector<16x64xf32>
      %c0_68 = arith.constant 0 : index
      %c0_69 = arith.constant 0 : index
      %197 = vector.load %arg10[%c0_68, %c0_69] : memref<16x64xf32, #tpu.memory_space<vmem>>, vector<16x64xf32>
      tpu.vector_store %arg10[%c0_68, %c0_69], %196 {strides = array<i32>} : memref<16x64xf32, #tpu.memory_space<vmem>>, vector<16x64xf32>,
    } else {
    }
    return
  }
  func.func @transform_0(%arg0: i32) -> (i32, i32) {
    %c0_i32 = arith.constant 0 : i32
    %c0_i32_0 = arith.constant 0 : i32
    %c0_i32_1 = arith.constant 0 : i32
    return %c0_i32, %c0_i32_0 : i32, i32
  }
  func.func @transform_1(%arg0: i32) -> (i32, i32, i32) {
    %c0_i32 = arith.constant 0 : i32
    %c0_i32_0 = arith.constant 0 : i32
    %c0_i32_1 = arith.constant 0 : i32
    return %arg0, %c0_i32, %c0_i32_0 : i32, i32, i32
  }
  func.func @transform_2(%arg0: i32) -> (i32, i32, i32) {
    %c0_i32 = arith.constant 0 : i32
    %c0_i32_0 = arith.constant 0 : i32
    %c0_i32_1 = arith.constant 0 : i32
    return %arg0, %c0_i32, %c0_i32_0 : i32, i32, i32
  }
  func.func @transform_3(%arg0: i32) -> (i32, i32, i32) {
    %c0_i32 = arith.constant 0 : i32
    %c0_i32_0 = arith.constant 0 : i32
    %c0_i32_1 = arith.constant 0 : i32
    return %arg0, %c0_i32, %c0_i32_0 : i32, i32, i32
  }
  func.func @transform_4(%arg0: i32) -> (i32, i32, i32) {
    %c0_i32 = arith.constant 0 : i32
    %c0_i32_0 = arith.constant 0 : i32
    %c0_i32_1 = arith.constant 0 : i32
    return %arg0, %c0_i32, %c0_i32_0 : i32, i32, i32
  }
  func.func @transform_5(%arg0: i32) -> (i32, i32, i32) {
    %c0_i32 = arith.constant 0 : i32
    %c0_i32_0 = arith.constant 0 : i32
    %c0_i32_1 = arith.constant 0 : i32
    return %arg0, %c0_i32, %c0_i32_0 : i32, i32, i32
  }
  func.func @transform_6(%arg0: i32) -> (i32, i32, i32) {
    %c0_i32 = arith.constant 0 : i32
    %c0_i32_0 = arith.constant 0 : i32
    %c0_i32_1 = arith.constant 0 : i32
    return %arg0, %c0_i32, %c0_i32_0 : i32, i32, i32
  }
  func.func @transform_7(%arg0: i32) -> (i32, i32, i32) {
    %c0_i32 = arith.constant 0 : i32
    %c0_i32_0 = arith.constant 0 : i32
    %c0_i32_1 = arith.constant 0 : i32
    return %arg0, %c0_i32, %c0_i32_0 : i32, i32, i32
  }
  func.func @transform_8(%arg0: i32) -> (i32, i32) {
    %c0_i32 = arith.constant 0 : i32
    %c0_i32_0 = arith.constant 0 : i32
    %c0_i32_1 = arith.constant 0 : i32
    return %c0_i32, %c0_i32_0 : i32, i32
  }
  func.func @transform_9(%arg0: i32) -> (i32, i32) {
    %c0_i32 = arith.constant 0 : i32
    %c0_i32_0 = arith.constant 0 : i32
    %c0_i32_1 = arith.constant 0 : i32
    return %c0_i32, %c0_i32_0 : i32, i32
  }
}

</mosaic_0001>

<bundles_post_ra>
// kernel: tpu_custom_call.1
= control target key start
LH: loop header
LB: loop body
LE: loop exit
PB: predicated region body
PF: predicated region fallthrough
CT: control target
= control target key end

     0   :  { %s2513_s0 = inlined_call_operand.vmem [shape: f32[16,64], index: 0, kind: input, shape index: {}]   ;;  %s2514_s1 = inlined_call_operand.vmem [shape: bf16[2,64,192], index: 1, kind: input, shape index: {}]   ;;  %s2515_s2 = inlined_call_operand.vmem [shape: f32[2,1,192], index: 2, kind: input, shape index: {}]   ;;  %s2516_s3 = inlined_call_operand.vmem [shape: bf16[2,64,64], index: 3, kind: input, shape index: {}]   ;;  %s2517_s4 = inlined_call_operand.hbm [shape: bf16[2,64,128], index: 4, kind: input, shape index: {}]   ;;  %s2518_s5 = inlined_call_operand.vmem [shape: f32[2,1,128], index: 5, kind: input, shape index: {}]   ;;  %s2519_s6 = inlined_call_operand.vmem [shape: bf16[2,128,64], index: 6, kind: input, shape index: {}]   ;;  %s2520_s7 = inlined_call_operand.vmem [shape: f32[2,6,64], index: 7, kind: input, shape index: {}]   ;;  %s2521_s8 = inlined_call_operand.vmem [shape: f32[2,64], index: 8, kind: input, shape index: {}]   ;;  %s2522_s9 = inlined_call_operand.hbm [shape: f32[16,64], index: 9, kind: output, shape index: {}]  }
   0x1   :  { %2524 = sst [smem:[#allocation10_spill]] %s2514_s1 }
   0x2   :  { %2525 = sst [smem:[#allocation11_spill]] %s2517_s4 }
   0x3   :  { %14 = vsyncpa [#allocation3], 0 }
   0x4   :  { %16 = vsyncpa [#allocation3 + $0x1], 0 }
   0x5   :  { %17 = vsyncpa [#allocation4], 0  ;;  %s2100_s30 = smov 0   ;;  %s2102_s10 = smov 0  }
   0x6   :  { %s2104_s11 = smov 0   ;;  %s2106_s12 = smov 0  }
   0x7 LB: > { %2526 = sst [smem:[#allocation8_spill]] %s2030_s11  ;;  %s2119_s13 = sadd.s32 4294967295, %s2034_s12   ;;  %s2034_s12 = sphi %s2106_s12, %s2539_s12   ;;  %s2030_s11 = sphi %s2104_s11, %s2536_s11   ;;  %s2026_s10 = sphi %s2102_s10, %s2538_s10   ;;  %s2022_s30 = sphi %s2100_s30, %s2537_s30  }
   0x8   : > { %s2122_s14 = sadd.s32 1, %s2034_s12   ;;  %s129_s16 = sadd.s32 1, %s2030_s11 }
   0x9   : > { %s126_s15 = ssub.s32 %s2034_s12, %s2122_s14  ;;  %p136_p1 = scmp.ne.s32.totalorder %s2030_s11, %s2026_s10 }
   0xa   : > { %p127_p0 = scmp.eq.s32.totalorder %s126_s15, 0  ;;  %p137_p2 = scmp.eq.s32.totalorder %s2034_s12, 0 }
   0xb   : > { %p142_p3 = scmp.ne.s32.totalorder %s2026_s10, %s2022_s30  ;;  %p143_p5 = scmp.eq.s32.totalorder %s2119_s13, 0 }
   0xc   : > { %s2132_s17 = scalar_select %p127_p0, %s2030_s11, %s129_s16  }
   0xd   : > { %p2134_p4 = por %p137_p2, %p136_p1  ;;  %p1801_p6 = scmp.lt.s32.totalorder %s2034_s12, 2 }
   0xe   : > { %2527 = sst [smem:[#allocation9_spill]] %s2132_s17  ;;  %p2140_p7 = por %p143_p5, %p142_p3 }
   0xf   : > { %s315_s20 = sand.u32 1, %s2030_s11   ;;  %s1763_s22 = sshll.u32 %s2034_s12, 5 }
  0x10   : > { %s1617_s21 = sshll.u32 %s315_s20, 5  ;;  %s2530_s4 = sld [smem:[#allocation11_spill]] }
  0x11   : > { %s319_s26 = scalar_lea.vmem [#allocation2], %s1617_s21  ;;  %p2151_p8 = pnand %p1801_p6, %p2134_p4 }
  0x12   : > { %s327_s27 = sshll.u32 %s319_s26, 4  ;;  %p1620_p9 = scmp.ge.s32.totalorder %s2034_s12, 1  ;;  %s328_s27 = int_to_ptr.vmem [resolvable:$true] %s327_s27 }
  0x13   : > { %s316_s30 = scalar_lea.sflag [#allocation3], %s315_s20  ;;  %p1942_p11 = pneg %p2151_p8 }
  0x16   : > { %s324_s25 = scalar_lea.hbm %s2530_s4, %s1763_s22  ;;  %s1945_s23 = scalar_lea.hbm %s2530_s4, 64 }
  0x17   : > { %s325_s28 = sshll.u32 %s324_s25, 4  ;;  %s326_s28 = int_to_ptr.hbm [resolvable:$true] %s325_s28 }
  0x18   : > { %s1938_s15 = sshra.s32 %s326_s28, 4  ;;  %s1939_s15 = int_to_ptr.hbm [resolvable:$true] %s1938_s15 }
  0x19   : > { %s1940_s16 = scalar_lea.hbm %s1939_s15, 32  ;;  %p1946_p0 = scmp.lt.s32.totalorder %s1939_s15, %s2530_s4 }
  0x1a   : > { %p1941_p10 = scmp.ne.s32.totalorder %s1939_s15, %s1940_s16  ;;  %p1947_p1 = scmp.lt.s32.totalorder %s1945_s23, %s1940_s16 }
  0x1c   : > { %p1943_p12 = pnand %p1942_p11, %p1941_p10  ;;  %p1948_p2 = por %p1947_p1, %p1946_p0 }
  0x1e   : > { %p1944_p13 = pneg %p1943_p12 }
  0x20   : > { %p1949_p3 = pnand %p1948_p2, %p1944_p13 }
  0x22   : > { %1952 = shalt.err (!%p1949_p3)
}
  0x23   : > { %s2036_s20 = smov 64   ;;  %s2037_s25 = smov 4  }
  0x24   : > { %1800 = dma.hbm_to_vmem [thread:$0]  (!%p2151_p8), %s326_s28, 512, %s328_s27, %s316_s30, %s2036_s20, %s2036_s20, %s2037_s25  }
  0x25   : > { %p356_p4 = scmp.lt.s32.totalorder %s2034_s12, 3 }
  0x27   : > { %p357_p5 = pnand %p1620_p9, %p356_p4 }
  0x28   : > { %s362_s26 = sand.u32 (!%p357_p5), 1, %s2026_s10  }
  0x29   : > { %360 = sbr.rel (%p357_p5) target bundleno = 2311 (0x907), region = 56  ;;  %s1621_s21 = sshll.u32 (!%p357_p5), %s362_s26, 5 }
  0x2a   : > { %s363_s15 = scalar_lea.sflag (!%p357_p5), [#allocation3], %s362_s26  ;;  %s2170_s16 = scalar_lea.vmem (!%p357_p5), [#allocation2], %s1621_s21 }
  0x2e   : > { %2013 = dma.done.wait (%p2140_p7), %s363_s15, 512  }
  0x2f   : > { %2015 = vsyncadd (%p2140_p7), %s363_s15, 4294966784  ;;  %p423_p6 = scmp.lt.s32.totalorder %s2119_s13, 1  ;;  %s2532_s1 = sld [smem:[#allocation10_spill]] }
  0x30   : > { %p1630_p7 = scmp.ne.s32.totalorder %s2119_s13, 0 }
  0x31   : > { %s2178_s27 = scalar_select %p423_p6, %s2119_s13, 1 }
  0x33   : > { %s1764_s12 = sshll.u32 %s2178_s27, 6  ;;  %s1624_s28 = sshll.u32 %s2178_s27, 1 }
  0x34   : > { %s2190_s18 = scalar_lea.vmem %s2515_s2, %s1624_s28  ;;  %s1765_s24 = sshll.u32 %s2178_s27, 5 }
  0x35   : > { %s2185_s22 = scalar_lea.vmem %s2532_s1, %s1764_s12  ;;  %s439_s26 = scalar_lea.vmem %s2518_s5, %s2178_s27 }
  0x36   : > { %s2200_s4 = scalar_lea.vmem %s2516_s3, %s1765_s24  ;;  %s2205_s29 = scalar_lea.vmem %s2519_s6, %s1764_s12 }
  0x37   : > { %s1629_s30 = sshll.u32 %s2178_s27, 3  ;;  %453 = sbr.rel (%p1630_p7) target bundleno = 63 (0x3f), region = 64 }
  0x38   : > { %s2211_s28 = scalar_lea.vmem %s2520_s7, %s1629_s30 }
  0x3c   : > { %v454_v0 = vld [vmem:[%s2513_s0] sm:$0xff]  ;;  %vm456_vm0 = vcmask 523264   ;;  %v455_v1 = vld [vmem:[%s2513_s0 + $0x8] sm:$0xff] }
  0x3d   : > { %457 = vst.msk [vmem:[#allocation5] sm:$0xff] %vm456_vm0, %v454_v0 }
  0x3e   : > { %458 = vst.msk [vmem:[#allocation5 + $0x8] sm:$0xff] %vm456_vm0, %v455_v1 }
  0x3f PF: > { %vm478_vm1 = vcmask 523264   ;;  %v2038_v6 = vmov 64.0   ;;  %v1657_v23 = vld [vmem:[%s2185_s22 + $0x30] sm:$0xf]  ;;  %v1774_v24 = vld [vmem:[%s2185_s22 + $0x34] sm:$0xf0] }
  0x40   : > { %1881 = vrcp.f32 %v2038_v6  ;;  %v1773_v25 = vld [vmem:[%s2185_s22 + $0x34] sm:$0xf]  ;;  %v1658_v26 = vor.u32 %v1774_v24, %v1657_v23  ;;  %v1659_v27 = vld [vmem:[%s2185_s22 + $0x38] sm:$0xf0]  ;;  %v1649_v29 = vld [vmem:[%s2185_s22 + $0x20] sm:$0xf] }
  0x41   : > { %v1662_v28 = vor.u32 %v1773_v25, %v1659_v27  ;;  %v1772_v30 = vld [vmem:[%s2185_s22 + $0x24] sm:$0xf0]  ;;  %v1771_v31 = vld [vmem:[%s2185_s22 + $0x24] sm:$0xf]  ;;  %v1651_v33 = vld [vmem:[%s2185_s22 + $0x28] sm:$0xf0] }
  0x42   : > { %598 = vmatpush.bf16.msra.mxu0 %v1658_v26  ;;  %v1650_v32 = vor.u32 %v1772_v30, %v1649_v29  ;;  %v1654_v34 = vor.u32 %v1771_v31, %v1651_v33  ;;  %v1641_v35 = vld [vmem:[%s2185_s22 + $0x10] sm:$0xf]  ;;  %v1770_v36 = vld [vmem:[%s2185_s22 + $0x14] sm:$0xf0]  ;;  %v1769_v37 = vld [vmem:[%s2185_s22 + $0x14] sm:$0xf] }
  0x43   : > { %612 = vmatpush.bf16.msra.mxu1 %v1662_v28  ;;  %v1642_v38 = vor.u32 %v1770_v36, %v1641_v35  ;;  %v1643_v39 = vld [vmem:[%s2185_s22 + $0x18] sm:$0xf0]  ;;  %v1633_v41 = vld [vmem:[%s2185_s22] sm:$0xf]  ;;  %v1768_v42 = vld [vmem:[%s2185_s22 + $0x4] sm:$0xf0] }
  0x44   : > { %v2220_v2 = vld [vmem:[#allocation5] sm:$0xff]  ;;  %v1646_v40 = vor.u32 %v1769_v37, %v1643_v39  ;;  %v1634_v45 = vor.u32 %v1768_v42, %v1633_v41  ;;  %v1635_v46 = vld [vmem:[%s2185_s22 + $0x8] sm:$0xf0]  ;;  %s2039_s1 = smov 48   ;;  %s2040_s11 = smov 64   ;;  %vm628_vm9 = vcmask 130048   ;;  %v461_v41 = vlaneseq }
  0x45   : > { %v479_v3 = vsel %vm478_vm1, %v2220_v2, 0.0  ;;  %v2224_v4 = vld [vmem:[#allocation5 + $0x8] sm:$0xff]  ;;  %v1767_v43 = vld [vmem:[%s2185_s22 + $0x4] sm:$0xf]  ;;  %s2041_s17 = smov 32   ;;  %s2042_s12 = smov 16  }
  0x46   : > { %480 = vadd.xlane.f32.xlu0 %v479_v3  ;;  %v482_v5 = vsel %vm478_vm1, %v2224_v4, 0.0  ;;  %v1882_v7 = vpop.eup %1881  ;;  %599 = vmatpush.bf16.msra.mxu0 %v1650_v32  ;;  %v1638_v48 = vor.u32 %v1767_v43, %v1635_v46  ;;  %v2263_v0 = vld [vmem:[%s2211_s28] sm:$0x3f]  ;;  %s2043_s22 = smov 96   ;;  %s2045_s21 = smov 80   ;;  %v462_v42 = vshrl.u32 %v461_v41, 7 }
  0x47   : > { %v486_v8 = vmul.f32 64.0, %v1882_v7  ;;  %vm490_vm2 = vweird.f32 %v1882_v7  ;;  %613 = vmatpush.bf16.msra.mxu1 %v1654_v34  ;;  %v465_v43 = vand.u32 127, %v461_v41  ;;  %p1757_p8 = scmp.ge.s32.totalorder %s2119_s13, 1 }
  0x48   : > { %v463_v46 = vadd.s32 8, %v462_v42 }
  0x49   : > { %v487_v9 = vsub.f32 1.0, %v486_v8  ;;  %vm471_vm11 = vcmp.le.s32.totalorder %v465_v43, %v462_v42 }
  0x4a   : > { %600 = vmatpush.bf16.msra.mxu0 %v1642_v38  ;;  %vm472_vm14 = vcmp.le.s32.totalorder %v465_v43, %v463_v46 }
  0x4b   : > { %v488_v10 = vmul.f32 %v1882_v7, %v487_v9  ;;  %614 = vmatpush.bf16.msra.mxu1 %v1646_v40 }
  0x4d   : > { %v489_v11 = vadd.f32 %v1882_v7, %v488_v10  ;;  %v533_v10 = vperm.slane %v2263_v0, 1 }
  0x4e   : > { %483 = vadd.xlane.f32.xlu0 %v482_v5  ;;  %601 = vmatpush.bf16.msra.mxu0 %v1634_v45  ;;  %v530_v5 = vperm.slane %v2263_v0, 0  ;;  %v468_v45 = vand.u32 4294967288, %v465_v43 }
  0x4f   : > { %v2228_v12 = vsel %vm490_vm2, %v1882_v7, %v489_v11  ;;  %615 = vmatpush.bf16.msra.mxu1 %v1638_v48  ;;  %v2046_v48 = vmov -1e+30  }
  0xb9   : > { %v481_v13 = vpop.xlane.xlu0 %480 }
  0xba   : > { %v492_v14 = vmul.f32 %v2228_v12, %v481_v13 }
  0xbc   : > { %v2232_v15 = vsub.f32 %v2220_v2, %v492_v14 }
  0xbe   : > { %v496_v16 = vmul.f32 %v2232_v15, %v2232_v15 }
  0xc0   : > { %v498_v17 = vsel %vm478_vm1, %v496_v16, 0.0 }
  0xc1   : > { %499 = vadd.xlane.f32.xlu1 %v498_v17  ;;  %v484_v18 = vpop.xlane.xlu0 %483 }
  0xc2   : > { %v493_v19 = vmul.f32 %v2228_v12, %v484_v18 }
  0xc4   : > { %v2239_v20 = vsub.f32 %v2224_v4, %v493_v19 }
  0xc6   : > { %v497_v21 = vmul.f32 %v2239_v20, %v2239_v20 }
  0xc8   : > { %v501_v22 = vsel %vm478_vm1, %v497_v21, 0.0 }
  0xc9   : > { %502 = vadd.xlane.f32.xlu1 %v501_v22 }
 0x134   : > { %v500_v44 = vpop.xlane.xlu1 %499 }
 0x135   : > { %v504_v47 = vmul.f32 %v500_v44, %v2228_v12  ;;  %v466_v44 = vand.u32 4294967288, %v462_v42 }
 0x137   : > { %v506_v49 = vadd.f32 1e-05, %v504_v47  ;;  %vm469_vm10 = vcmp.eq.s32.totalorder %v466_v44, %v468_v45  ;;  %v467_v47 = vand.u32 4294967288, %v463_v46 }
 0x138   : > { %vm473_vm12 = vmand %vm469_vm10, %vm471_vm11 }
 0x139   : > { %1883 = vrsqrt.f32 %v506_v49  ;;  %vm514_vm4 = vweird.f32 %v506_v49  ;;  %vm470_vm13 = vcmp.eq.s32.totalorder %v467_v47, %v468_v45 }
 0x13a   : > { %vm474_vm15 = vmand %vm470_vm13, %vm472_vm14 }
 0x13c   : > { %v503_v50 = vpop.xlane.xlu1 %502 }
 0x13d   : > { %v505_v51 = vmul.f32 %v503_v50, %v2228_v12 }
 0x13f   : > { %v1884_v52 = vpop.eup %1883  ;;  %v507_v53 = vadd.f32 1e-05, %v505_v51 }
 0x140   : > { %v509_v54 = vmul.f32 %v1884_v52, %v506_v49  ;;  %vm515_vm3 = vweird.f32 %v1884_v52  ;;  %v475_v49 = vsel %vm473_vm12, 0.0, %v2046_v48 }
 0x141   : > { %1885 = vrsqrt.f32 %v507_v53  ;;  %vm516_vm5 = vmor %vm514_vm4, %vm515_vm3  ;;  %vm524_vm7 = vweird.f32 %v507_v53 }
 0x142   : > { %v510_v55 = vmul.f32 %v1884_v52, %v509_v54 }
 0x144   : > { %v511_v56 = vmul.f32 0.5, %v510_v55 }
 0x146   : > { %v512_v57 = vsub.f32 1.5, %v511_v56 }
 0x147   : > { %v1886_v58 = vpop.eup %1885 }
 0x148   : > { %v513_v59 = vmul.f32 %v1884_v52, %v512_v57  ;;  %v519_v60 = vmul.f32 %v1886_v58, %v507_v53  ;;  %vm525_vm6 = vweird.f32 %v1886_v58  ;;  %v476_v53 = vsel %vm474_vm15, 0.0, %v2046_v48 }
 0x149   : > { %vm526_vm8 = vmor %vm524_vm7, %vm525_vm6 }
 0x14a   : > { %v520_v61 = vmul.f32 %v1886_v58, %v519_v60  ;;  %v517_v62 = vsel %vm516_vm5, %v1884_v52, %v513_v59 }
 0x14b   : > { %v528_v3 = vmul.f32 %v517_v62, %v2232_v15  ;;  %v545_v15 = vld [vmem:[%s2190_s18] sm:$0x3]  ;;  %s2044_s18 = smov 112  }
 0x14c   : > { %v521_v63 = vmul.f32 0.5, %v520_v61  ;;  %v547_v17 = vperm.slane %v545_v15, 0  ;;  %v548_v25 = vperm.slane %v545_v15, 1 }
 0x14d   : > { %v531_v9 = vmul.f32 %v530_v5, %v528_v3 }
 0x14e   : > { %v522_v1 = vsub.f32 1.5, %v521_v63 }
 0x14f   : > { %v534_v13 = vadd.f32 %v533_v10, %v531_v9 }
 0x150   : > { %v523_v6 = vmul.f32 %v1886_v58, %v522_v1 }
 0x152   : > { %v527_v7 = vsel %vm526_vm8, %v1886_v58, %v523_v6 }
 0x153   : > { %v529_v8 = vmul.f32 %v527_v7, %v2239_v20 }
 0x155   : > { %v532_v11 = vmul.f32 %v530_v5, %v529_v8 }
 0x157   : > { %v535_v14 = vadd.f32 %v533_v10, %v532_v11 }
 0x159   : > { %v536_v16 = vpack.c.bf16 %v535_v14, %v534_v13 }
 0x15b   : > { %1663 = vmatmul.msk.bf16.vlgmr.msra.gmra.mxu0 %vm478_vm1, %v536_v16  ;;  %1664 = vmatmul.msk.bf16.vlgmr.msra.gmra.mxu1 %vm478_vm1, %v536_v16 }
 0x1d8   : > { %v603_v18 = vpop.f32.mrf.mxu0  ;;  %v617_v22 = vpop.f32.mrf.mxu1 }
 0x1d9   : > { %v604_v19 = vadd.f32 %v603_v18, %v547_v17  ;;  %v2289_v28 = vadd.f32 %v617_v22, %v548_v25 }
 0x1db   : > { %741 = vrot.lane.b32.xlu1 %v604_v19, %s2039_s1 }
 0x1e0   : > { %v605_v21 = vpop.f32.mrf.mxu0  ;;  %v619_v24 = vpop.f32.mrf.mxu1 }
 0x1e1   : > { %v606_v20 = vadd.f32 %v605_v21, %v547_v17  ;;  %v2285_v26 = vadd.f32 %v619_v24, %v548_v25 }
 0x1e3   : > { %743 = vrot.lane.b32.xlu0 %v606_v20, %s2039_s1  ;;  %626 = vrot.lane.b32.xlu2 %v606_v20, %s2040_s11 }
 0x1e4   : > { %867 = vrot.lane.b32.xlu1 %v606_v20, %s2041_s17 }
 0x1eb   : > { %987 = vrot.lane.b32.xlu0 %v604_v19, %s2042_s12  ;;  %624 = vrot.lane.b32.xlu2 %v604_v19, %s2040_s11 }
 0x1ec   : > { %861 = vrot.lane.b32.xlu1 %v604_v19, %s2043_s22 }
 0x1f3   : > { %865 = vrot.lane.b32.xlu0 %v604_v19, %s2041_s17  ;;  %737 = vrot.lane.b32.xlu2 %v604_v19, %s2044_s18 }
 0x1fb   : > { %863 = vrot.lane.b32.xlu0 %v606_v20, %s2043_s22  ;;  %739 = vrot.lane.b32.xlu2 %v606_v20, %s2044_s18 }
 0x203   : > { %989 = vrot.lane.b32.xlu2 %v606_v20, %s2042_s12 }
 0x20b   : > { %983 = vrot.lane.b32.xlu2 %v604_v19, %s2045_s21 }
 0x213   : > { %985 = vrot.lane.b32.xlu2 %v606_v20, %s2045_s21 }
 0x23d   : > { %v627_v23 = vpop.permute.xlu2 %626 }
 0x23e   : > { %1665 = vmatpush.xpose.msk.msra.mxu2 %vm628_vm9, %v627_v23 }
 0x245   : > { %v625_v27 = vpop.permute.xlu2 %624 }
 0x246   : > { %1666 = vmatpush.xpose.msk.msra.mxu2 %vm628_vm9, %v625_v27 }
 0x249   : > { %1667 = vmatmul.msk.f32.vlgmr.msra.gmra.mxu2 %vm628_vm9, %v604_v19 }
 0x24a   : > { %728 = vmatpush.msrb.mxu2 %v2285_v26 }
 0x24c   : > { %729 = vmatpush.msrb.mxu2 %v2289_v28 }
 0x24d   : > { %v742_v29 = vpop.permute.xlu1 %741  ;;  %v738_v30 = vpop.permute.xlu2 %737 }
 0x251   : > { %1668 = vmatmul.msk.f32.gmra.mxu2 %vm628_vm9, %v606_v20 }
 0x255   : > { %v744_v31 = vpop.permute.xlu0 %743  ;;  %v740_v32 = vpop.permute.xlu2 %739 }
 0x256   : > { %v868_v33 = vpop.permute.xlu1 %867  ;;  %1671 = vmatpush.xpose.msk.msra.mxu3 %vm628_vm9, %v744_v31 }
 0x257   : > { %1677 = vmatpush.xpose.msk.msrb.mxu0 %vm628_vm9, %v868_v33 }
 0x25a   : > { %1672 = vmatpush.xpose.msk.msra.mxu3 %vm628_vm9, %v742_v29 }
 0x25d   : > { %v988_v34 = vpop.permute.xlu0 %987  ;;  %1673 = vmatmul.msk.f32.vlgmr.msra.gmra.mxu3 %vm628_vm9, %v738_v30  ;;  %v990_v35 = vpop.permute.xlu2 %989 }
 0x25e   : > { %1683 = vmatpush.xpose.msk.msrb.mxu3 %vm628_vm9, %v990_v35  ;;  %v862_v37 = vpop.permute.xlu1 %861 }
 0x262   : > { %1684 = vmatpush.xpose.msk.msrb.mxu3 %vm628_vm9, %v988_v34 }
 0x265   : > { %v866_v36 = vpop.permute.xlu0 %865  ;;  %1674 = vmatmul.msk.f32.gmra.mxu3 %vm628_vm9, %v740_v32  ;;  %v984_v38 = vpop.permute.xlu2 %983 }
 0x266   : > { %1678 = vmatpush.xpose.msk.msrb.mxu0 %vm628_vm9, %v866_v36 }
 0x269   : > { %1679 = vmatmul.msk.f32.vlgmr.msrb.gmra.mxu0 %vm628_vm9, %v862_v37 }
 0x26d   : > { %1685 = vmatmul.msk.f32.vlgmr.msrb.gmra.mxu3 %vm628_vm9, %v984_v38  ;;  %v864_v39 = vpop.permute.xlu0 %863  ;;  %v986_v40 = vpop.permute.xlu2 %985 }
 0x271   : > { %1680 = vmatmul.msk.f32.gmra.mxu0 %vm628_vm9, %v864_v39 }
 0x275   : > { %1686 = vmatmul.msk.f32.gmra.mxu3 %vm628_vm9, %v986_v40 }
 0x2cc   : > { %v654_v50 = vpop.f32.mrf.mxu2 }
 0x2cd   : > { %v655_v51 = vadd.f32 %v654_v50, %v475_v49 }
 0x2cf   : > { %v660_v52 = vsel %vm628_vm9, %v655_v51, -inf }
 0x2d0   : > { %661 = vmax.xlane.f32.xlu2 %v660_v52 }
 0x2d4   : > { %v657_v54 = vpop.f32.mrf.mxu2 }
 0x2d5   : > { %v658_v55 = vadd.f32 %v657_v54, %v476_v53  ;;  %v1850_v54 = vpack.i.bf16 %v2289_v28, %v2285_v26 }
 0x2d7   : > { %v663_v56 = vsel %vm628_vm9, %v658_v55, -inf }
 0x2d8   : > { %664 = vmax.xlane.f32.xlu1 %v663_v56 }
 0x2e0   : > { %v770_v57 = vpop.f32.mrf.mxu3 }
 0x2e1   : > { %v771_v58 = vadd.f32 %v770_v57, %v475_v49 }
 0x2e3   : > { %v776_v59 = vsel %vm628_vm9, %v771_v58, -inf }
 0x2e4   : > { %777 = vmax.xlane.f32.xlu0 %v776_v59 }
 0x2e6   : > { %v894_v60 = vpop.f32.mrf.mxu0 }
 0x2e7   : > { %v895_v61 = vadd.f32 %v894_v60, %v475_v49 }
 0x2e8   : > { %v773_v62 = vpop.f32.mrf.mxu3 }
 0x2e9   : > { %v774_v63 = vadd.f32 %v773_v62, %v476_v53  ;;  %v900_v1 = vsel %vm628_vm9, %v895_v61, -inf }
 0x2eb   : > { %v779_v3 = vsel %vm628_vm9, %v774_v63, -inf }
 0x2ec   : > { %901 = vmax.xlane.f32.xlu0 %v900_v1  ;;  %780 = vmax.xlane.f32.xlu2 %v779_v3 }
 0x2ee   : > { %v897_v8 = vpop.f32.mrf.mxu0 }
 0x2ef   : > { %v898_v9 = vadd.f32 %v897_v8, %v476_v53 }
 0x2f0   : > { %v1016_v5 = vpop.f32.mrf.mxu3 }
 0x2f1   : > { %v1017_v6 = vadd.f32 %v1016_v5, %v475_v49  ;;  %v903_v13 = vsel %vm628_vm9, %v898_v9, -inf }
 0x2f3   : > { %v1022_v7 = vsel %vm628_vm9, %v1017_v6, -inf }
 0x2f4   : > { %1023 = vmax.xlane.f32.xlu1 %v1022_v7 }
 0x2f8   : > { %v1019_v10 = vpop.f32.mrf.mxu3 }
 0x2f9   : > { %v1020_v11 = vadd.f32 %v1019_v10, %v476_v53 }
 0x2fb   : > { %v1025_v14 = vsel %vm628_vm9, %v1020_v11, -inf }
 0x2fc   : > { %904 = vmax.xlane.f32.xlu1 %v903_v13  ;;  %1026 = vmax.xlane.f32.xlu2 %v1025_v14 }
 0x343   : > { %v662_v16 = vpop.xlane.xlu2 %661 }
 0x344   : > { %v666_v15 = vsub.f32 %v655_v51, %v662_v16 }
 0x346   : > { %v668_v17 = vmul.f32 1.442695, %v666_v15 }
 0x348   : > { %1887 = vpow2.f32 %v668_v17 }
 0x34b   : > { %v665_v18 = vpop.xlane.xlu1 %664 }
 0x34c   : > { %v667_v19 = vsub.f32 %v658_v55, %v665_v18 }
 0x34e   : > { %v2314_v21 = vpop.eup %1887  ;;  %v670_v20 = vmul.f32 1.442695, %v667_v19 }
 0x34f   : > { %v672_v22 = vsel %vm628_vm9, %v2314_v21, 0.0 }
 0x350   : > { %1889 = vpow2.f32 %v670_v20  ;;  %673 = vadd.xlane.f32.xlu0 %v672_v22 }
 0x356   : > { %v2318_v23 = vpop.eup %1889 }
 0x357   : > { %v778_v24 = vpop.xlane.xlu0 %777  ;;  %v675_v25 = vsel %vm628_vm9, %v2318_v23, 0.0 }
 0x358   : > { %v782_v27 = vsub.f32 %v771_v58, %v778_v24  ;;  %676 = vadd.xlane.f32.xlu2 %v675_v25 }
 0x35a   : > { %v784_v29 = vmul.f32 1.442695, %v782_v27 }
 0x35c   : > { %1891 = vpow2.f32 %v784_v29 }
 0x35f   : > { %v902_v30 = vpop.xlane.xlu0 %901  ;;  %v781_v35 = vpop.xlane.xlu2 %780 }
 0x360   : > { %v906_v31 = vsub.f32 %v895_v61, %v902_v30  ;;  %v783_v46 = vsub.f32 %v774_v63, %v781_v35 }
 0x362   : > { %v2322_v32 = vpop.eup %1891  ;;  %v908_v33 = vmul.f32 1.442695, %v906_v31  ;;  %v786_v50 = vmul.f32 1.442695, %v783_v46 }
 0x363   : > { %v788_v34 = vsel %vm628_vm9, %v2322_v32, 0.0 }
 0x364   : > { %1893 = vpow2.f32 %v908_v33  ;;  %789 = vadd.xlane.f32.xlu1 %v788_v34 }
 0x367   : > { %v1024_v36 = vpop.xlane.xlu1 %1023 }
 0x368   : > { %v1028_v37 = vsub.f32 %v1017_v6, %v1024_v36 }
 0x36a   : > { %v2326_v38 = vpop.eup %1893  ;;  %v1030_v39 = vmul.f32 1.442695, %v1028_v37 }
 0x36b   : > { %v912_v40 = vsel %vm628_vm9, %v2326_v38, 0.0 }
 0x36c   : > { %1895 = vpow2.f32 %v1030_v39  ;;  %913 = vadd.xlane.f32.xlu0 %v912_v40 }
 0x36f   : > { %v905_v41 = vpop.xlane.xlu1 %904  ;;  %v1027_v42 = vpop.xlane.xlu2 %1026 }
 0x370   : > { %v907_v43 = vsub.f32 %v898_v9, %v905_v41  ;;  %v1029_v44 = vsub.f32 %v1020_v11, %v1027_v42 }
 0x372   : > { %v2330_v45 = vpop.eup %1895  ;;  %v910_v47 = vmul.f32 1.442695, %v907_v43  ;;  %v1032_v48 = vmul.f32 1.442695, %v1029_v44 }
 0x373   : > { %v1034_v49 = vsel %vm628_vm9, %v2330_v45, 0.0 }
 0x374   : > { %1897 = vpow2.f32 %v910_v47  ;;  %1035 = vadd.xlane.f32.xlu2 %v1034_v49 }
 0x375   : > { %1899 = vpow2.f32 %v1032_v48 }
 0x376   : > { %1901 = vpow2.f32 %v786_v50 }
 0x37a   : > { %v2334_v51 = vpop.eup %1897 }
 0x37b   : > { %v2336_v52 = vpop.eup %1899  ;;  %v915_v53 = vsel %vm628_vm9, %v2334_v51, 0.0 }
 0x37c   : > { %916 = vadd.xlane.f32.xlu0 %v915_v53  ;;  %v1037_v55 = vsel %vm628_vm9, %v2336_v52, 0.0  ;;  %v2345_v56 = vpop.eup %1901 }
 0x37d   : > { %1038 = vadd.xlane.f32.xlu2 %v1037_v55  ;;  %1851 = vrot.lane.b32.xlu1 %v1850_v54, %s2044_s18  ;;  %v791_v57 = vsel %vm628_vm9, %v2345_v56, 0.0 }
 0x384   : > { %792 = vadd.xlane.f32.xlu0 %v791_v57 }
 0x395   : > { %1856 = vrot.lane.b32.xlu2 %v1850_v54, %s2045_s21 }
 0x398   : > { %1861 = vrot.lane.b32.xlu0 %v1850_v54, %s2043_s22 }
 0x3c3   : > { %v674_v58 = vpop.xlane.xlu0 %673 }
 0x3c4   : > { %1903 = vrcp.f32 %v674_v58  ;;  %v689_v61 = vand.u32 2147483648, %v674_v58  ;;  %v687_v63 = vand.u32 2147483647, %v674_v58  ;;  %vm683_vm2 = vweird.f32 %v674_v58 }
 0x3c6   : > { %v690_v5 = vor.u32 1.1754944e-38, %v689_v61  ;;  %vm688_vm4 = vcmp.eq.f32.partialorder %v687_v63, 8.507059e+37 }
 0x3ca   : > { %v1904_v26 = vpop.eup %1903 }
 0x3cb   : > { %v679_v28 = vmul.f32 %v1904_v26, %v674_v58  ;;  %v677_v59 = vpop.xlane.xlu2 %676  ;;  %vm684_vm0 = vweird.f32 %v1904_v26 }
 0x3cc   : > { %1905 = vrcp.f32 %v677_v59  ;;  %vm685_vm3 = vmor %vm683_vm2, %vm684_vm0  ;;  %v704_v11 = vand.u32 2147483648, %v677_v59  ;;  %v702_v16 = vand.u32 2147483647, %v677_v59  ;;  %vm698_vm6 = vweird.f32 %v677_v59 }
 0x3cd   : > { %v680_v60 = vsub.f32 1.0, %v679_v28 }
 0x3ce   : > { %v705_v17 = vor.u32 1.1754944e-38, %v704_v11  ;;  %vm703_vm8 = vcmp.eq.f32.partialorder %v702_v16, 8.507059e+37 }
 0x3cf   : > { %v681_v62 = vmul.f32 %v1904_v26, %v680_v60 }
 0x3d1   : > { %v682_v1 = vadd.f32 %v1904_v26, %v681_v62 }
 0x3d2   : > { %v1906_v3 = vpop.eup %1905 }
 0x3d3   : > { %v694_v6 = vmul.f32 %v1906_v3, %v677_v59  ;;  %v686_v7 = vsel %vm685_vm3, %v1904_v26, %v682_v1  ;;  %vm699_vm5 = vweird.f32 %v1906_v3 }
 0x3d4   : > { %v691_v8 = vsel %vm688_vm4, %v690_v5, %v686_v7  ;;  %vm700_vm7 = vmor %vm698_vm6, %vm699_vm5 }
 0x3d5   : > { %v695_v9 = vsub.f32 1.0, %v694_v6  ;;  %v692_v10 = vmul.f32 %v2314_v21, %v691_v8 }
 0x3d7   : > { %v696_v13 = vmul.f32 %v1906_v3, %v695_v9  ;;  %v790_v14 = vpop.xlane.xlu1 %789  ;;  %1669 = vmatmul.msk.f32.vlgmr.msrb.gmra.mxu2 %vm628_vm9, %v692_v10 }
 0x3d8   : > { %1907 = vrcp.f32 %v790_v14  ;;  %v805_v31 = vand.u32 2147483648, %v790_v14  ;;  %vm799_vm11 = vweird.f32 %v790_v14  ;;  %v803_v33 = vand.u32 2147483647, %v790_v14 }
 0x3d9   : > { %v697_v15 = vadd.f32 %v1906_v3, %v696_v13 }
 0x3da   : > { %v806_v35 = vor.u32 1.1754944e-38, %v805_v31  ;;  %vm804_vm13 = vcmp.eq.f32.partialorder %v803_v33, 8.507059e+37 }
 0x3db   : > { %v701_v18 = vsel %vm700_vm7, %v1906_v3, %v697_v15 }
 0x3dc   : > { %v706_v19 = vsel %vm703_vm8, %v705_v17, %v701_v18 }
 0x3dd   : > { %v707_v20 = vmul.f32 %v2318_v23, %v706_v19 }
 0x3de   : > { %v1908_v22 = vpop.eup %1907 }
 0x3df   : > { %v795_v24 = vmul.f32 %v1908_v22, %v790_v14  ;;  %1670 = vmatmul.msk.f32.gmra.mxu2 %vm628_vm9, %v707_v20  ;;  %v2355_v27 = vpop.xlane.xlu0 %913  ;;  %vm800_vm10 = vweird.f32 %v1908_v22 }
 0x3e0   : > { %vm801_vm12 = vmor %vm799_vm11, %vm800_vm10  ;;  %1909 = vrcp.f32 %v2355_v27  ;;  %v929_v7 = vand.u32 2147483648, %v2355_v27  ;;  %vm923_vm2 = vweird.f32 %v2355_v27  ;;  %v927_v9 = vand.u32 2147483647, %v2355_v27 }
 0x3e1   : > { %v796_v21 = vsub.f32 1.0, %v795_v24 }
 0x3e2   : > { %v930_v20 = vor.u32 1.1754944e-38, %v929_v7  ;;  %vm928_vm8 = vcmp.eq.f32.partialorder %v927_v9, 8.507059e+37 }
 0x3e3   : > { %v797_v25 = vmul.f32 %v1908_v22, %v796_v21 }
 0x3e5   : > { %v798_v30 = vadd.f32 %v1908_v22, %v797_v25 }
 0x3e6   : > { %v1910_v43 = vpop.eup %1909 }
 0x3e7   : > { %v2357_v29 = vpop.xlane.xlu2 %1035  ;;  %v802_v34 = vsel %vm801_vm12, %v1908_v22, %v798_v30  ;;  %v919_v47 = vmul.f32 %v1910_v43, %v2355_v27  ;;  %vm924_vm15 = vweird.f32 %v1910_v43 }
 0x3e8   : > { %v807_v37 = vsel %vm804_vm13, %v806_v35, %v802_v34  ;;  %1911 = vrcp.f32 %v2357_v29  ;;  %vm2387_vm5 = vmor %vm923_vm2, %vm924_vm15  ;;  %v1051_v15 = vand.u32 2147483648, %v2357_v29  ;;  %vm1045_vm7 = vweird.f32 %v2357_v29 }
 0x3e9   : > { %v808_v42 = vmul.f32 %v2322_v32, %v807_v37  ;;  %v920_v53 = vsub.f32 1.0, %v919_v47  ;;  %v1049_v22 = vand.u32 2147483647, %v2357_v29 }
 0x3ea   : > { %v1052_v33 = vor.u32 1.1754944e-38, %v1051_v15 }
 0x3eb   : > { %v921_v28 = vmul.f32 %v1910_v43, %v920_v53  ;;  %vm1050_vm12 = vcmp.eq.f32.partialorder %v1049_v22, 8.507059e+37 }
 0x3ed   : > { %v922_v5 = vadd.f32 %v1910_v43, %v921_v28  ;;  %v1778_v28 = vld [vmem:[%s2200_s4 + $0x18] sm:$0xff] }
 0x3ee   : > { %v2367_v44 = vpop.eup %1911  ;;  %1178 = vmatpush.bf16.msra.mxu0 %v1778_v28 }
 0x3ef   : > { %v1852_v23 = vpop.permute.xlu1 %1851  ;;  %v2360_v36 = vpop.xlane.xlu0 %916  ;;  %v1041_v50 = vmul.f32 %v2367_v44, %v2357_v29  ;;  %vm1046_vm3 = vweird.f32 %v2367_v44  ;;  %v926_v19 = vsel %vm2387_vm5, %v1910_v43, %v922_v5  ;;  %vm1131_vm5 = vcmask 261120  }
 0x3f0   : > { %v1853_v39 = vunpack.i.l.bf16 %v1852_v23  ;;  %v2362_v40 = vpop.xlane.xlu2 %1038  ;;  %v1854_v41 = vunpack.i.h.bf16 %v1852_v23  ;;  %1913 = vrcp.f32 %v2360_v36  ;;  %vm1047_vm10 = vmor %vm1045_vm7, %vm1046_vm3  ;;  %v931_v31 = vsel %vm928_vm8, %v930_v20, %v926_v19 }
 0x3f1   : > { %v1042_v57 = vsub.f32 1.0, %v1041_v50  ;;  %vm938_vm13 = vweird.f32 %v2360_v36  ;;  %v932_v23 = vmul.f32 %v2326_v38, %v931_v31  ;;  %v942_v37 = vand.u32 2147483647, %v2360_v36 }
 0x3f2   : > { %852 = vmatpush.msra.mxu2 %v1853_v39  ;;  %v1064_v38 = vand.u32 2147483647, %v2362_v40 }
 0x3f3   : > { %v1043_v61 = vmul.f32 %v2367_v44, %v1042_v57  ;;  %vm943_vm2 = vcmp.eq.f32.partialorder %v942_v37, 8.507059e+37 }
 0x3f4   : > { %853 = vmatpush.msra.mxu2 %v1854_v41  ;;  %v1066_v41 = vand.u32 2147483648, %v2362_v40 }
 0x3f5   : > { %1675 = vmatmul.msk.f32.vlgmr.msra.gmra.mxu2 %vm628_vm9, %v808_v42  ;;  %v1044_v13 = vadd.f32 %v2367_v44, %v1043_v61  ;;  %v1775_v61 = vld [vmem:[%s2200_s4] sm:$0xff] }
 0x3f6   : > { %v2374_v54 = vpop.eup %1913  ;;  %v1067_v47 = vor.u32 1.1754944e-38, %v1066_v41  ;;  %v1781_v41 = vld [vmem:[%s2170_s16 + $0x10] sm:$0xff] }
 0x3f7   : > { %v793_v46 = vpop.xlane.xlu0 %792  ;;  %v934_v59 = vmul.f32 %v2374_v54, %v2360_v36  ;;  %v1048_v25 = vsel %vm1047_vm10, %v2367_v44, %v1044_v13  ;;  %vm939_vm11 = vweird.f32 %v2374_v54 }
 0x3f8   : > { %1915 = vrcp.f32 %v793_v46  ;;  %v1857_v48 = vpop.permute.xlu2 %1856  ;;  %v820_v62 = vand.u32 2147483648, %v793_v46  ;;  %v818_v3 = vand.u32 2147483647, %v793_v46  ;;  %vm814_vm0 = vweird.f32 %v793_v46 }
 0x3f9   : > { %v1858_v49 = vunpack.i.l.bf16 %v1857_v48  ;;  %1917 = vrcp.f32 %v2362_v40  ;;  %v1859_v32 = vunpack.i.h.bf16 %v1857_v48  ;;  %v935_v6 = vsub.f32 1.0, %v934_v59  ;;  %v1777_v59 = vld [vmem:[%s2200_s4 + $0x10] sm:$0xff] }
 0x3fa   : > { %v821_v10 = vor.u32 1.1754944e-38, %v820_v62  ;;  %vm819_vm6 = vcmp.eq.f32.partialorder %v818_v3, 8.507059e+37  ;;  %v1053_v35 = vsel %vm1050_vm12, %v1052_v33, %v1048_v25  ;;  %1179 = vmatpush.bf16.msra.mxu0 %v1777_v59 }
 0x3fb   : > { %1096 = vmatpush.msrb.mxu2 %v1858_v49  ;;  %v936_v17 = vmul.f32 %v2374_v54, %v935_v6  ;;  %v1054_v44 = vmul.f32 %v2330_v45, %v1053_v35 }
 0x3fd   : > { %1097 = vmatpush.msrb.mxu2 %v1859_v32  ;;  %v937_v34 = vadd.f32 %v2374_v54, %v936_v17 }
 0x3fe   : > { %v1916_v55 = vpop.eup %1915 }
 0x3ff   : > { %v810_v58 = vmul.f32 %v1916_v55, %v793_v46  ;;  %v2376_v26 = vpop.eup %1917  ;;  %vm815_vm14 = vweird.f32 %v1916_v55 }
 0x400   : > { %v1056_v63 = vmul.f32 %v2376_v26, %v2362_v40  ;;  %vm816_vm4 = vmor %vm814_vm0, %vm815_vm14  ;;  %vm1061_vm15 = vweird.f32 %v2376_v26  ;;  %vm1060_vm0 = vweird.f32 %v2362_v40 }
 0x401   : > { %v811_v60 = vsub.f32 1.0, %v810_v58  ;;  %vm940_vm14 = vmor %vm938_vm13, %vm939_vm11 }
 0x402   : > { %v1057_v14 = vsub.f32 1.0, %v1056_v63  ;;  %v941_v42 = vsel %vm940_vm14, %v2374_v54, %v937_v34  ;;  %vm1062_vm3 = vmor %vm1060_vm0, %vm1061_vm15 }
 0x403   : > { %v812_v1 = vmul.f32 %v1916_v55, %v811_v60  ;;  %v1776_v60 = vld [vmem:[%s2200_s4 + $0x8] sm:$0xff] }
 0x404   : > { %v1058_v27 = vmul.f32 %v2376_v26, %v1057_v14  ;;  %1180 = vmatpush.bf16.msra.mxu0 %v1776_v60 }
 0x405   : > { %v813_v8 = vadd.f32 %v1916_v55, %v812_v1 }
 0x406   : > { %v1059_v39 = vadd.f32 %v2376_v26, %v1058_v27 }
 0x407   : > { %v817_v16 = vsel %vm816_vm4, %v1916_v55, %v813_v8  ;;  %vm1065_vm4 = vcmp.eq.f32.partialorder %v1064_v38, 8.507059e+37 }
 0x408   : > { %v822_v18 = vsel %vm819_vm6, %v821_v10, %v817_v16  ;;  %v1063_v46 = vsel %vm1062_vm3, %v2376_v26, %v1059_v39  ;;  %1181 = vmatpush.bf16.msra.mxu0 %v1775_v61  ;;  %vm1134_vm6 = vcmask 392192   ;;  %v1782_v39 = vld [vmem:[%s2170_s16 + $0x18] sm:$0xff]  ;;  %v1237_v61 = vperm.slane %v2263_v0, 3 }
 0x409   : > { %v823_v24 = vmul.f32 %v2345_v56, %v822_v18  ;;  %v944_v56 = vand.u32 2147483648, %v2360_v36  ;;  %v1068_v49 = vsel %vm1065_vm4, %v1067_v47, %v1063_v46  ;;  %v1146_v18 = vperm.slane %v2263_v0, 4 }
 0x40a   : > { %v1862_v21 = vpop.permute.xlu0 %1861  ;;  %v1069_v50 = vmul.f32 %v2336_v52, %v1068_v49 }
 0x40b   : > { %1676 = vmatmul.msk.f32.gmra.mxu2 %vm628_vm9, %v823_v24  ;;  %v1863_v30 = vunpack.i.l.bf16 %v1862_v21  ;;  %v1864_v29 = vunpack.i.h.bf16 %v1862_v21  ;;  %v945_v43 = vor.u32 1.1754944e-38, %v944_v56 }
 0x40d   : > { %974 = vmatpush.msrb.mxu1 %v1863_v30  ;;  %v946_v36 = vsel %vm943_vm2, %v945_v43, %v941_v42 }
 0x40e   : > { %v947_v48 = vmul.f32 %v2334_v51, %v946_v36  ;;  %v1779_v36 = vld [vmem:[%s2170_s16] sm:$0xff] }
 0x40f   : > { %975 = vmatpush.msrb.mxu1 %v1864_v29 }
 0x410   : > { %1681 = vmatmul.msk.f32.vlgmr.msrb.gmra.mxu1 %vm628_vm9, %v932_v23 }
 0x411   : > { %1284 = vmatpush.bf16.msra.mxu1 %v1782_v39 }
 0x413   : > { %1687 = vmatmul.msk.f32.vlgmr.msrb.gmra.mxu2 %vm628_vm9, %v1054_v44  ;;  %v1780_v44 = vld [vmem:[%s2170_s16 + $0x8] sm:$0xff] }
 0x415   : > { %1285 = vmatpush.bf16.msra.mxu1 %v1781_v41 }
 0x418   : > { %1682 = vmatmul.msk.f32.gmra.mxu1 %vm628_vm9, %v947_v48 }
 0x419   : > { %1286 = vmatpush.bf16.msra.mxu1 %v1780_v44 }
 0x41b   : > { %1688 = vmatmul.msk.f32.gmra.mxu2 %vm628_vm9, %v1069_v50 }
 0x41d   : > { %1287 = vmatpush.bf16.msra.mxu1 %v1779_v36 }
 0x45a   : > { %v731_v45 = vpop.f32.mrf.mxu2 }
 0x462   : > { %v734_v40 = vpop.f32.mrf.mxu2 }
 0x478   : > { %v855_v32 = vpop.f32.mrf.mxu2 }
 0x48d   : > { %v977_v53 = vpop.f32.mrf.mxu1 }
 0x48e   : > { %v858_v54 = vpop.f32.mrf.mxu2 }
 0x48f   : > { %v1865_v55 = vpack.i.bf16 %v858_v54, %v855_v32 }
 0x491   : > { %1866 = vrot.lane.b32.xlu1 %v1865_v55, %s2042_s12 }
 0x495   : > { %v980_v51 = vpop.f32.mrf.mxu1 }
 0x496   : > { %v1870_v57 = vpack.i.bf16 %v980_v51, %v977_v53  ;;  %v1099_v58 = vpop.f32.mrf.mxu2 }
 0x499   : > { %1871 = vrot.lane.b32.xlu1 %v1870_v57, %s2041_s17 }
 0x49e   : > { %v1102_v52 = vpop.f32.mrf.mxu2 }
 0x49f   : > { %v1875_v26 = vpack.i.bf16 %v1102_v52, %v1099_v58 }
 0x4a1   : > { %1876 = vrot.lane.b32.xlu2 %v1875_v26, %s2039_s1  ;;  %v1234_v26 = vperm.slane %v2263_v0, 2  ;;  %v1880_v0 = vld [vmem:[%s439_s26] ss:$0 sm:$0xff] }
 0x4fb   : > { %v1877_v3 = vpop.permute.xlu2 %1876 }
 0x4fc   : > { %v1879_v8 = vunpack.i.h.bf16 %v1877_v3  ;;  %v1878_v9 = vunpack.i.l.bf16 %v1877_v3 }
 0x503   : > { %v1867_v62 = vpop.permute.xlu1 %1866 }
 0x504   : > { %v1869_v63 = vunpack.i.h.bf16 %v1867_v62  ;;  %v1868_v1 = vunpack.i.l.bf16 %v1867_v62 }
 0x506   : > { %v1130_v10 = vsel %vm628_vm9, %v734_v40, %v1869_v63  ;;  %v1129_v11 = vsel %vm628_vm9, %v731_v45, %v1868_v1 }
 0x50b   : > { %v1872_v5 = vpop.permute.xlu1 %1871 }
 0x50c   : > { %v1874_v6 = vunpack.i.h.bf16 %v1872_v5  ;;  %v1873_v7 = vunpack.i.l.bf16 %v1872_v5 }
 0x50e   : > { %v1132_v13 = vsel %vm1131_vm5, %v1129_v11, %v1873_v7  ;;  %v1133_v14 = vsel %vm1131_vm5, %v1130_v10, %v1874_v6  ;;  %v1790_v7 = vld [vmem:[%s2205_s29 + $0x38] sm:$0xff]  ;;  %v1787_v10 = vld [vmem:[%s2205_s29 + $0x20] sm:$0xff] }
 0x50f   : > { %v1135_v16 = vsel %vm1134_vm6, %v1132_v13, %v1878_v9  ;;  %v1136_v15 = vsel %vm1134_vm6, %v1133_v14, %v1879_v8  ;;  %1401 = vmatpush.bf16.msra.mxu3 %v1790_v7  ;;  %v1789_v8 = vld [vmem:[%s2205_s29 + $0x30] sm:$0xff]  ;;  %v1788_v9 = vld [vmem:[%s2205_s29 + $0x28] sm:$0xff]  ;;  %v1786_v11 = vld [vmem:[%s2205_s29 + $0x18] sm:$0xff] }
 0x510   : > { %v1137_v17 = vpack.c.bf16 %v1136_v15, %v1135_v16  ;;  %v1785_v15 = vld [vmem:[%s2205_s29 + $0x10] sm:$0xff] }
 0x512   : > { %1705 = vmatmul.msk.bf16.vlgmr.msra.gmra.mxu0 %vm478_vm1, %v1137_v17 }
 0x513   : > { %1402 = vmatpush.bf16.msra.mxu3 %v1789_v8 }
 0x517   : > { %1403 = vmatpush.bf16.msra.mxu3 %v1788_v9 }
 0x51b   : > { %1404 = vmatpush.bf16.msra.mxu3 %v1787_v10 }
 0x51f   : > { %1405 = vmatpush.bf16.msra.mxu3 %v1786_v11 }
 0x523   : > { %1406 = vmatpush.bf16.msra.mxu3 %v1785_v15 }
 0x58f   : > { %v1183_v19 = vpop.f32.mrf.mxu0 }
 0x590   : > { %v1184_v20 = vadd.f32 %v1183_v19, %v1146_v18 }
 0x592   : > { %v2436_v22 = vadd.f32 %v1184_v20, %v2220_v2 }
 0x594   : > { %v1190_v24 = vsel %vm478_vm1, %v2436_v22, 0.0 }
 0x595   : > { %1191 = vadd.xlane.f32.xlu0 %v1190_v24 }
 0x597   : > { %v1185_v21 = vpop.f32.mrf.mxu0 }
 0x598   : > { %v1186_v25 = vadd.f32 %v1185_v21, %v1146_v18  ;;  %v1784_v18 = vld [vmem:[%s2205_s29 + $0x8] sm:$0xff]  ;;  %v1783_v21 = vld [vmem:[%s2205_s29] sm:$0xff] }
 0x599   : > { %1407 = vmatpush.bf16.msra.mxu3 %v1784_v18 }
 0x59a   : > { %v2441_v27 = vadd.f32 %v1186_v25, %v2224_v4 }
 0x59c   : > { %v1193_v30 = vsel %vm478_vm1, %v2441_v27, 0.0 }
 0x59d   : > { %1194 = vadd.xlane.f32.xlu1 %v1193_v30  ;;  %1408 = vmatpush.bf16.msra.mxu3 %v1783_v21 }
 0x608   : > { %v1192_v31 = vpop.xlane.xlu0 %1191 }
 0x609   : > { %v1196_v33 = vmul.f32 %v1192_v31, %v2228_v12 }
 0x60b   : > { %v1198_v2 = vsub.f32 %v2436_v22, %v1196_v33 }
 0x60d   : > { %v1200_v34 = vmul.f32 %v1198_v2, %v1198_v2 }
 0x60f   : > { %v1202_v56 = vsel %vm478_vm1, %v1200_v34, 0.0 }
 0x610   : > { %v1195_v29 = vpop.xlane.xlu1 %1194  ;;  %1203 = vadd.xlane.f32.xlu2 %v1202_v56 }
 0x611   : > { %v1197_v4 = vmul.f32 %v1195_v29, %v2228_v12 }
 0x613   : > { %v1199_v35 = vsub.f32 %v2441_v27, %v1197_v4 }
 0x615   : > { %v1201_v23 = vmul.f32 %v1199_v35, %v1199_v35 }
 0x617   : > { %v1205_v37 = vsel %vm478_vm1, %v1201_v23, 0.0 }
 0x618   : > { %1206 = vadd.xlane.f32.xlu0 %v1205_v37 }
 0x683   : > { %v1204_v42 = vpop.xlane.xlu2 %1203 }
 0x684   : > { %v1208_v43 = vmul.f32 %v1204_v42, %v2228_v12 }
 0x686   : > { %v1210_v38 = vadd.f32 1e-05, %v1208_v43 }
 0x688   : > { %1919 = vrsqrt.f32 %v1210_v38  ;;  %vm1218_vm7 = vweird.f32 %v1210_v38 }
 0x68b   : > { %v1207_v46 = vpop.xlane.xlu0 %1206 }
 0x68c   : > { %v1209_v47 = vmul.f32 %v1207_v46, %v2228_v12 }
 0x68e   : > { %v1920_v48 = vpop.eup %1919  ;;  %v1211_v49 = vadd.f32 1e-05, %v1209_v47 }
 0x68f   : > { %v1213_v50 = vmul.f32 %v1920_v48, %v1210_v38  ;;  %vm1219_vm9 = vweird.f32 %v1920_v48 }
 0x690   : > { %1921 = vrsqrt.f32 %v1211_v49  ;;  %vm1220_vm8 = vmor %vm1218_vm7, %vm1219_vm9  ;;  %vm1228_vm11 = vweird.f32 %v1211_v49 }
 0x691   : > { %v1214_v45 = vmul.f32 %v1920_v48, %v1213_v50 }
 0x693   : > { %v1215_v40 = vmul.f32 0.5, %v1214_v45 }
 0x695   : > { %v1216_v32 = vsub.f32 1.5, %v1215_v40 }
 0x696   : > { %v1922_v53 = vpop.eup %1921 }
 0x697   : > { %v1217_v54 = vmul.f32 %v1920_v48, %v1216_v32  ;;  %v1223_v55 = vmul.f32 %v1922_v53, %v1211_v49  ;;  %vm1229_vm10 = vweird.f32 %v1922_v53 }
 0x698   : > { %vm1230_vm12 = vmor %vm1228_vm11, %vm1229_vm10 }
 0x699   : > { %v1224_v51 = vmul.f32 %v1922_v53, %v1223_v55  ;;  %v1221_v57 = vsel %vm1220_vm8, %v1920_v48, %v1217_v54  ;;  %v1931_v54 = vld [vmem:[%s2211_s28] sm:$0x3f] }
 0x69a   : > { %v1232_v28 = vmul.f32 %v1221_v57, %v1198_v2  ;;  %v1417_v55 = vperm.slane %v1931_v54, 5 }
 0x69b   : > { %v1225_v58 = vmul.f32 0.5, %v1224_v51 }
 0x69c   : > { %v1235_v62 = vmul.f32 %v1234_v26, %v1232_v28 }
 0x69d   : > { %v1226_v52 = vsub.f32 1.5, %v1225_v58 }
 0x69e   : > { %v1238_v3 = vadd.f32 %v1237_v61, %v1235_v62 }
 0x69f   : > { %v1227_v59 = vmul.f32 %v1922_v53, %v1226_v52 }
 0x6a1   : > { %v1231_v60 = vsel %vm1230_vm12, %v1922_v53, %v1227_v59 }
 0x6a2   : > { %v1233_v63 = vmul.f32 %v1231_v60, %v1199_v35 }
 0x6a4   : > { %v1236_v1 = vmul.f32 %v1234_v26, %v1233_v63 }
 0x6a6   : > { %v1239_v5 = vadd.f32 %v1237_v61, %v1236_v1 }
 0x6a8   : > { %v1240_v6 = vpack.c.bf16 %v1239_v5, %v1238_v3 }
 0x6aa   : > { %1722 = vmatmul.msk.bf16.vlgmr.msra.gmra.mxu1 %vm478_vm1, %v1240_v6 }
 0x727   : > { %v1289_v13 = vpop.f32.mrf.mxu1 }
 0x728   : > { %v1290_v14 = vadd.f32 %v1880_v0, %v1289_v13 }
 0x72a   : > { %v1723_v16 = vmul.f32 -1.702, %v1290_v14 }
 0x72c   : > { %v1298_v17 = vmul.f32 1.442695, %v1723_v16 }
 0x72e   : > { %1923 = vpow2.f32 %v1298_v17 }
 0x72f   : > { %v1291_v19 = vpop.f32.mrf.mxu1 }
 0x730   : > { %v1292_v20 = vadd.f32 %v1880_v0, %v1291_v19 }
 0x732   : > { %v1724_v24 = vmul.f32 -1.702, %v1292_v20 }
 0x734   : > { %v1924_v25 = vpop.eup %1923  ;;  %v1300_v30 = vmul.f32 1.442695, %v1724_v24 }
 0x735   : > { %v1302_v31 = vadd.f32 1.0, %v1924_v25 }
 0x736   : > { %1925 = vpow2.f32 %v1300_v30 }
 0x737   : > { %1927 = vrcp.f32 %v1302_v31  ;;  %v1315_v39 = vand.u32 2147483648, %v1302_v31  ;;  %vm1309_vm14 = vweird.f32 %v1302_v31  ;;  %v1313_v41 = vand.u32 2147483647, %v1302_v31 }
 0x739   : > { %v1316_v46 = vor.u32 1.1754944e-38, %v1315_v39  ;;  %vm1314_vm2 = vcmp.eq.f32.partialorder %v1313_v41, 8.507059e+37 }
 0x73c   : > { %v1926_v33 = vpop.eup %1925 }
 0x73d   : > { %v1928_v2 = vpop.eup %1927  ;;  %v1303_v34 = vadd.f32 1.0, %v1926_v33 }
 0x73e   : > { %v1305_v56 = vmul.f32 %v1928_v2, %v1302_v31  ;;  %vm1310_vm13 = vweird.f32 %v1928_v2 }
 0x73f   : > { %1929 = vrcp.f32 %v1303_v34  ;;  %vm1311_vm15 = vmor %vm1309_vm14, %vm1310_vm13  ;;  %v1330_v43 = vand.u32 2147483648, %v1303_v34  ;;  %v1328_v36 = vand.u32 2147483647, %v1303_v34  ;;  %vm1324_vm3 = vweird.f32 %v1303_v34 }
 0x740   : > { %v1306_v29 = vsub.f32 1.0, %v1305_v56 }
 0x741   : > { %v1331_v49 = vor.u32 1.1754944e-38, %v1330_v43  ;;  %vm1329_vm5 = vcmp.eq.f32.partialorder %v1328_v36, 8.507059e+37 }
 0x742   : > { %v1307_v4 = vmul.f32 %v1928_v2, %v1306_v29 }
 0x744   : > { %v1308_v23 = vadd.f32 %v1928_v2, %v1307_v4 }
 0x745   : > { %v1930_v35 = vpop.eup %1929 }
 0x746   : > { %v1320_v37 = vmul.f32 %v1930_v35, %v1303_v34  ;;  %v1312_v44 = vsel %vm1311_vm15, %v1928_v2, %v1308_v23  ;;  %vm1325_vm0 = vweird.f32 %v1930_v35 }
 0x747   : > { %v1317_v48 = vsel %vm1314_vm2, %v1316_v46, %v1312_v44  ;;  %vm1326_vm4 = vmor %vm1324_vm3, %vm1325_vm0 }
 0x748   : > { %v1321_v42 = vsub.f32 1.0, %v1320_v37  ;;  %v1334_v40 = vmul.f32 %v1317_v48, %v1290_v14 }
 0x74a   : > { %v1322_v38 = vmul.f32 %v1930_v35, %v1321_v42 }
 0x74c   : > { %v1323_v47 = vadd.f32 %v1930_v35, %v1322_v38 }
 0x74e   : > { %v1327_v50 = vsel %vm1326_vm4, %v1930_v35, %v1323_v47 }
 0x74f   : > { %v1332_v45 = vsel %vm1329_vm5, %v1331_v49, %v1327_v50 }
 0x750   : > { %v1335_v32 = vmul.f32 %v1332_v45, %v1292_v20 }
 0x752   : > { %v1336_v53 = vpack.c.bf16 %v1335_v32, %v1334_v40 }
 0x754   : > { %1409 = vmatmul.bf16.vlgmr.msra.gmra.mxu3 %v1336_v53 }
 0x7d7   : > { %v1410_v51 = vpop.f32.mrf.mxu3 }
 0x7d8   : > { %v1415_v57 = vadd.f32 %v1410_v51, %v2436_v22 }
 0x7da   : > { %v1418_v58 = vadd.f32 %v1417_v55, %v1415_v57 }
 0x7de   : > { %1423 = sbr.rel (%p1757_p8) target bundleno = 2021 (0x7e5), region = 68 }
 0x7df   : > { %v1412_v52 = vpop.f32.mrf.mxu3 }
 0x7e0   : > { %v1416_v26 = vadd.f32 %v1412_v52, %v2441_v27 }
 0x7e2   : > { %v1419_v28 = vadd.f32 %v1417_v55, %v1416_v26 }
 0x7e3   : > { %1424 = vst.msk [vmem:[#allocation5] sm:$0xff] %vm478_vm1, %v1418_v58 }
 0x7e4   : > { %1425 = vst.msk [vmem:[#allocation5 + $0x8] sm:$0xff] %vm478_vm1, %v1419_v28 }
 0x7e5 PF: > { %p1758_p9 = scmp.ne.s32.totalorder %s2119_s13, 1 }
 0x7e7   : > { %1429 = sbr.rel (%p1758_p9) target bundleno = 2305 (0x901), region = 72 }
 0x7ec   : > { %v1432_v59 = vsel %vm478_vm1, %v1418_v58, 0.0  ;;  %v1435_v22 = vsel %vm478_vm1, %v1419_v28, 0.0  ;;  %v1932_v21 = vld [vmem:[%s2521_s8] ss:$0 sm:$0xff]  ;;  %v1933_v31 = vld [vmem:[%s2521_s8 + $0x1] ss:$0 sm:$0xff] }
 0x7ed   : > { %1433 = vadd.xlane.f32.xlu0 %v1432_v59 }
 0x7f5   : > { %1436 = vadd.xlane.f32.xlu0 %v1435_v22 }
 0x860   : > { %v1434_v60 = vpop.xlane.xlu0 %1433 }
 0x861   : > { %v1438_v27 = vmul.f32 %v1434_v60, %v2228_v12 }
 0x863   : > { %v1440_v61 = vsub.f32 %v1418_v58, %v1438_v27 }
 0x865   : > { %v1442_v62 = vmul.f32 %v1440_v61, %v1440_v61 }
 0x867   : > { %v1444_v63 = vsel %vm478_vm1, %v1442_v62, 0.0 }
 0x868   : > { %1445 = vadd.xlane.f32.xlu1 %v1444_v63  ;;  %v1437_v1 = vpop.xlane.xlu0 %1436 }
 0x869   : > { %v1439_v3 = vmul.f32 %v1437_v1, %v2228_v12 }
 0x86b   : > { %v1441_v5 = vsub.f32 %v1419_v28, %v1439_v3 }
 0x86d   : > { %v1443_v6 = vmul.f32 %v1441_v5, %v1441_v5 }
 0x86f   : > { %v1447_v7 = vsel %vm478_vm1, %v1443_v6, 0.0 }
 0x870   : > { %1448 = vadd.xlane.f32.xlu1 %v1447_v7 }
 0x8db   : > { %v1446_v8 = vpop.xlane.xlu1 %1445 }
 0x8dc   : > { %v1450_v9 = vmul.f32 %v1446_v8, %v2228_v12 }
 0x8de   : > { %v1452_v10 = vadd.f32 1e-05, %v1450_v9 }
 0x8e0   : > { %1934 = vrsqrt.f32 %v1452_v10  ;;  %vm1460_vm9 = vweird.f32 %v1452_v10 }
 0x8e3   : > { %v1449_v0 = vpop.xlane.xlu1 %1448 }
 0x8e4   : > { %v1451_v11 = vmul.f32 %v1449_v0, %v2228_v12 }
 0x8e6   : > { %v1935_v13 = vpop.eup %1934  ;;  %v1453_v14 = vadd.f32 1e-05, %v1451_v11 }
 0x8e7   : > { %v1455_v16 = vmul.f32 %v1935_v13, %v1452_v10  ;;  %vm1461_vm6 = vweird.f32 %v1935_v13 }
 0x8e8   : > { %1936 = vrsqrt.f32 %v1453_v14  ;;  %vm1462_vm7 = vmor %vm1460_vm9, %vm1461_vm6  ;;  %vm1470_vm10 = vweird.f32 %v1453_v14 }
 0x8e9   : > { %v1456_v15 = vmul.f32 %v1935_v13, %v1455_v16 }
 0x8eb   : > { %v1457_v17 = vmul.f32 0.5, %v1456_v15 }
 0x8ed   : > { %v1458_v18 = vsub.f32 1.5, %v1457_v17 }
 0x8ee   : > { %v1937_v19 = vpop.eup %1936 }
 0x8ef   : > { %v1459_v20 = vmul.f32 %v1935_v13, %v1458_v18  ;;  %v1465_v24 = vmul.f32 %v1937_v19, %v1453_v14  ;;  %vm1471_vm8 = vweird.f32 %v1937_v19 }
 0x8f0   : > { %vm1472_vm11 = vmor %vm1470_vm10, %vm1471_vm8 }
 0x8f1   : > { %v1463_v25 = vsel %vm1462_vm7, %v1935_v13, %v1459_v20  ;;  %v1466_v30 = vmul.f32 %v1937_v19, %v1465_v24 }
 0x8f2   : > { %v1474_v12 = vmul.f32 %v1463_v25, %v1440_v61 }
 0x8f3   : > { %v1467_v33 = vmul.f32 0.5, %v1466_v30 }
 0x8f4   : > { %v1477_v2 = vmul.f32 %v1932_v21, %v1474_v12 }
 0x8f5   : > { %v1468_v34 = vsub.f32 1.5, %v1467_v33 }
 0x8f6   : > { %v1480_v56 = vadd.f32 %v1933_v31, %v1477_v2 }
 0x8f7   : > { %v1469_v29 = vmul.f32 %v1937_v19, %v1468_v34 }
 0x8f8   : > { %1482 = vst.msk [vmem:[#allocation5] sm:$0xff] %vm478_vm1, %v1480_v56 }
 0x8f9   : > { %v1473_v4 = vsel %vm1472_vm11, %v1937_v19, %v1469_v29 }
 0x8fa   : > { %v1475_v35 = vmul.f32 %v1473_v4, %v1441_v5 }
 0x8fc   : > { %v1478_v23 = vmul.f32 %v1932_v21, %v1475_v35 }
 0x8fe   : > { %v1481_v37 = vadd.f32 %v1933_v31, %v1478_v23 }
 0x900   : > { %1483 = vst.msk [vmem:[#allocation5 + $0x8] sm:$0xff] %vm478_vm1, %v1481_v37 }
 0x901 PF: > { %p1802_p10 = scmp.eq.s32.totalorder %s2119_s13, 1  ;;  %s2047_s30 = smov [#allocation5]  }
 0x902   : > { %s1489_s23 = sshll.u32 %s2047_s30, 4  ;;  %s1491_s20 = sshll.u32 %s2522_s9, 4  ;;  %s1490_s23 = int_to_ptr.vmem [resolvable:$true] %s1489_s23  ;;  %s1492_s20 = int_to_ptr.hbm [resolvable:$true] %s1491_s20 }
 0x903   : > { %s2048_s24 = smov 128   ;;  %s2049_s25 = smov 8  }
 0x904   : > { %1794 = dma.vmem_to_hbm [thread:$0]  (%p1802_p10), %s1490_s23, 256, %s1492_s20, [#allocation4], %s2048_s24, %s2048_s24, %s2049_s25  }
 0x905   : > { %2017 = dma.done.wait (%p1802_p10), [#allocation4], 256  }
 0x906   : > { %2019 = vsyncadd (%p1802_p10), [#allocation4], 4294967040 }
 0x907 PF: > { %s2535_s1 = sld [smem:[#allocation8_spill]]  ;;  %p20_p11 = scmp.ge.s32.totalorder %s2122_s14, 4  }
 0x908   : > { %s2536_s11 = sld [smem:[#allocation9_spill]]  ;;  %s2537_s30 = smov %s2026_s10 }
 0x909   : > { %s2539_s12 = smov %s2122_s14  ;;  %22 = sbr.rel (!%p20_p11) target bundleno = 7 (0x7), region = 123 }
 0x90d   : > { %s2538_s10 = smov %s2535_s1 }
 0x90e   :  { %1508 = vsyncpa [#allocation3], 1 }
 0x90f   :  { %1510 = vsyncpa [#allocation3 + $0x1], 1 }
 0x910   :  { %1511 = vsyncpa [#allocation4], 1 }
 0x911   :  { %1513 = vsyncpa [#allocation4 + $0x1], 1 }

</bundles_post_ra>
